<compile_context>
chip_gen: v5e
topology: v5e:2x2
jax: 0.10.0
libtpu: 0.0.40
codegen_flags: <defaults>
</compile_context>

<pallas_src>
import functools

import jax
import jax.numpy as jnp
import numpy as np
from jax import lax
from jax.experimental import pallas as pl
from jax.experimental.pallas import tpu as pltpu

_BF16 = jnp.bfloat16
_F32 = jnp.float32


# --------------------------- tiling / VMEM budget ---------------------------


@functools.lru_cache(maxsize=None)
def _vmem_capacity_bytes():
    try:
        cap = int(pltpu.get_tpu_info().vmem_capacity_bytes)
        if cap > 0:
            return cap
    except Exception:
        pass
    return 64 * 1024 * 1024          # conservative (v7x-sized) fallback


def _vmem_limit_bytes():
    # ~75% of physical VMEM: ~48 MiB on v7x, ~96 MiB on v5e/v6e.
    return int(_vmem_capacity_bytes() * 3 // 4)


def _weight_tile_target():
    # v7x (64 MiB VMEM) -> 2x smaller weight / N tiles than v5e/v6e (128 MiB).
    return 256 if _vmem_capacity_bytes() < (96 << 20) else 512


def _attn_tile_targets():
    small = _vmem_capacity_bytes() < (96 << 20)
    return (128 if small else 256, 128)     # (tq, tk); 128-aligned for v5e MXU


def _tile(dim, target):
    """Largest divisor of `dim` that is <= target (falls back to small divisors)."""
    t = min(dim, target)
    while dim % t:
        t //= 2
    return t


def _cp(semantics):
    return pltpu.CompilerParams(dimension_semantics=semantics,
                                vmem_limit_bytes=_vmem_limit_bytes())


# ----------------------------- Pallas kernels ------------------------------


def _qkv_kernel(x_ref, nw_ref, w_ref, b_ref, o_ref, xn_ref, *, eps):
    """Fused pre-attention RMSNorm + fused QKV projection (one matmul).

    grid = (row_tiles, n_tiles); the normalized activations are computed once
    per row tile (n == 0) and cached in bf16 VMEM scratch.
    """
    j = pl.program_id(1)

    @pl.when(j == 0)
    def _():
        x = x_ref[...].astype(_F32)
        xn = x * lax.rsqrt(jnp.mean(x * x, axis=-1, keepdims=True) + eps) * nw_ref[...]
        xn_ref[...] = xn.astype(_BF16)

    o_ref[...] = (jnp.dot(xn_ref[...], w_ref[...], preferred_element_type=_F32)
                  + b_ref[...]).astype(_BF16)


def _flash_attn_kernel(q_ref, k_ref, v_ref, o_ref, m_sc, l_sc, acc_sc, *,
                       scale, tq, tk):
    """Flash-style causal attention for one (batch, head, q-tile, kv-tile) step.

    kv axis is the innermost ("arbitrary") grid axis; m/l/acc scratch carries
    the online softmax state across kv tiles.  GQA head mapping is done by the
    K/V BlockSpec index_map (no jnp.tile).
    """
    qi = pl.program_id(2)
    ki = pl.program_id(3)

    @pl.when(ki == 0)
    def _():
        m_sc[...] = jnp.full(m_sc.shape, -1e30, m_sc.dtype)
        l_sc[...] = jnp.zeros(l_sc.shape, l_sc.dtype)
        acc_sc[...] = jnp.zeros(acc_sc.shape, acc_sc.dtype)

    # Skip kv tiles that lie entirely above the causal diagonal.
    @pl.when(ki * tk <= qi * tq + (tq - 1))
    def _():
        q = q_ref[0, 0]                                     # (tq, D) bf16
        k = k_ref[0, 0]                                     # (tk, D) bf16
        v = v_ref[0, 0]
        s = jnp.dot(q, k.T, preferred_element_type=_F32) * scale   # (tq, tk) f32
        row = qi * tq + lax.broadcasted_iota(jnp.int32, (tq, tk), 0)
        col = ki * tk + lax.broadcasted_iota(jnp.int32, (tq, tk), 1)
        s = s + jnp.where(col > row, -1e30, 0.0)            # finite causal mask

        m_prev = m_sc[...]
        m_new = jnp.maximum(m_prev, jnp.max(s, axis=-1, keepdims=True))
        alpha = jnp.exp(m_prev - m_new)
        p = jnp.exp(s - m_new)
        l_sc[...] = alpha * l_sc[...] + jnp.sum(p, axis=-1, keepdims=True)
        acc_sc[...] = alpha * acc_sc[...] + jnp.dot(
            p.astype(_BF16), v, preferred_element_type=_F32)
        m_sc[...] = m_new

    @pl.when(ki == pl.num_programs(3) - 1)
    def _():
        o_ref[0, 0] = (acc_sc[...] *
                       pl.reciprocal(l_sc[...], approx=True)).astype(_BF16)


def _oproj_kernel(res_ref, ctx_ref, wo_ref, bo_ref, o_ref):
    """Attention output projection (output-column tiled) + fused residual add."""
    y = jnp.dot(ctx_ref[...], wo_ref[...], preferred_element_type=_F32) + bo_ref[...]
    o_ref[...] = (res_ref[...].astype(_F32) + y).astype(_BF16)


def _ffn_kernel(x_ref, nw_ref, wu_ref, bu_ref, wg_ref, bg_ref, wd_ref, bd_ref,
                o_ref, acc_ref, xn_ref, *, eps):
    """Post-attention RMSNorm + SwiGLU FFN + residual.

    grid = (row_tiles, hidden_tiles); the hidden dim is simultaneously the
    output tile of up/gate and the contraction tile of the down projection,
    accumulated into f32 VMEM scratch.
    """
    j = pl.program_id(1)

    @pl.when(j == 0)
    def _():
        x = x_ref[...].astype(_F32)
        xn = x * lax.rsqrt(jnp.mean(x * x, axis=-1, keepdims=True) + eps) * nw_ref[...]
        xn_ref[...] = xn.astype(_BF16)
        acc_ref[...] = jnp.zeros(acc_ref.shape, acc_ref.dtype)

    xb = xn_ref[...]
    up = jnp.dot(xb, wu_ref[...], preferred_element_type=_F32) + bu_ref[...]
    gate = jnp.dot(xb, wg_ref[...], preferred_element_type=_F32) + bg_ref[...]
    silu = gate * pl.reciprocal(1.0 + jnp.exp(-gate), approx=True)     # f32, EUP
    h = (silu * up).astype(_BF16)
    acc_ref[...] += jnp.dot(h, wd_ref[...], preferred_element_type=_F32)

    @pl.when(j == pl.num_programs(1) - 1)
    def _():
        o_ref[...] = (x_ref[...].astype(_F32) + acc_ref[...] + bd_ref[...]).astype(_BF16)


def _final_norm_kernel(x_ref, nw_ref, o_ref, *, eps):
    """Final RMSNorm (computed once, not per vocab tile)."""
    x = x_ref[...].astype(_F32)
    xn = x * lax.rsqrt(jnp.mean(x * x, axis=-1, keepdims=True) + eps) * nw_ref[...]
    o_ref[...] = xn.astype(_BF16)


def _lm_head_kernel(xn_ref, w_ref, b_ref, o_ref):
    """lm_head linear over one lane-dense vocab tile."""
    o_ref[...] = jnp.dot(xn_ref[...], w_ref[...],
                         preferred_element_type=_F32) + b_ref[...]


# ----------------------------- Pallas wrappers -----------------------------


def qkv_proj(x2, lp, eps=1e-6):
    N, E = x2.shape
    Ek = lp['wk'].shape[1]
    F = E + 2 * Ek
    w = jnp.concatenate([lp['wq'], lp['wk'], lp['wv']], axis=1).astype(_BF16)
    b = jnp.concatenate([lp['bq'], lp['bk'], lp['bv']], axis=1)
    TM = _tile(N, 256)
    TN = _tile(F, _weight_tile_target())
    kern = functools.partial(_qkv_kernel, eps=eps)
    return pl.pallas_call(
        kern,
        out_shape=jax.ShapeDtypeStruct((N, F), _BF16),
        grid=(N // TM, F // TN),
        in_specs=[pl.BlockSpec((TM, E), lambda i, j: (i, 0)),
                  pl.BlockSpec((1, E), lambda i, j: (0, 0)),
                  pl.BlockSpec((E, TN), lambda i, j: (0, j)),
                  pl.BlockSpec((1, TN), lambda i, j: (0, j))],
        out_specs=pl.BlockSpec((TM, TN), lambda i, j: (i, j)),
        scratch_shapes=[pltpu.VMEM((TM, E), _BF16)],
        compiler_params=_cp(("parallel", "arbitrary")),
    )(x2, lp['pre_norm'].reshape(1, E), w, b)


def attn_core(q4, k4, v4, nheads):
    B, H, T, D = q4.shape
    nkv = k4.shape[1]
    tq_t, tk_t = _attn_tile_targets()
    tq = _tile(T, tq_t)
    tk = _tile(T, tk_t)
    scale = 1.0 / (float(nheads) ** 0.5)      # torch divides by sqrt(nheads)
    kern = functools.partial(_flash_attn_kernel, scale=scale, tq=tq, tk=tk)
    return pl.pallas_call(
        kern,
        out_shape=jax.ShapeDtypeStruct((B, H, T, D), _BF16),
        grid=(B, H, T // tq, T // tk),
        in_specs=[
            pl.BlockSpec((1, 1, tq, D), lambda b, h, qi, ki: (b, h, qi, 0)),
            pl.BlockSpec((1, 1, tk, D),
                         lambda b, h, qi, ki: (b, lax.rem(h, nkv), ki, 0)),
            pl.BlockSpec((1, 1, tk, D),
                         lambda b, h, qi, ki: (b, lax.rem(h, nkv), ki, 0)),
        ],
        out_specs=pl.BlockSpec((1, 1, tq, D), lambda b, h, qi, ki: (b, h, qi, 0)),
        scratch_shapes=[pltpu.VMEM((tq, 1), _F32),
                        pltpu.VMEM((tq, 1), _F32),
                        pltpu.VMEM((tq, D), _F32)],
        compiler_params=_cp(("parallel", "parallel", "parallel", "arbitrary")),
    )(q4, k4, v4)


def out_proj(res2, ctx2, lp):
    N, E = res2.shape
    TM = _tile(N, 256)
    TN = _tile(E, _weight_tile_target())
    return pl.pallas_call(
        _oproj_kernel,
        out_shape=jax.ShapeDtypeStruct((N, E), _BF16),
        grid=(N // TM, E // TN),
        in_specs=[pl.BlockSpec((TM, TN), lambda i, j: (i, j)),
                  pl.BlockSpec((TM, E), lambda i, j: (i, 0)),
                  pl.BlockSpec((E, TN), lambda i, j: (0, j)),
                  pl.BlockSpec((1, TN), lambda i, j: (0, j))],
        out_specs=pl.BlockSpec((TM, TN), lambda i, j: (i, j)),
        input_output_aliases={0: 0},          # residual add-into: reuse HBM buffer
        compiler_params=_cp(("parallel", "parallel")),
    )(res2, ctx2, lp['wo'].astype(_BF16), lp['bo'])


def ffn_block(x2, lp, eps=1e-6):
    N, E = x2.shape
    Hd = lp['wu'].shape[1]
    TM = _tile(N, 256)
    TH = _tile(Hd, _weight_tile_target())
    kern = functools.partial(_ffn_kernel, eps=eps)
    return pl.pallas_call(
        kern,
        out_shape=jax.ShapeDtypeStruct((N, E), _BF16),
        grid=(N // TM, Hd // TH),
        in_specs=[
            pl.BlockSpec((TM, E), lambda i, j: (i, 0)),
            pl.BlockSpec((1, E), lambda i, j: (0, 0)),
            pl.BlockSpec((E, TH), lambda i, j: (0, j)),
            pl.BlockSpec((1, TH), lambda i, j: (0, j)),
            pl.BlockSpec((E, TH), lambda i, j: (0, j)),
            pl.BlockSpec((1, TH), lambda i, j: (0, j)),
            pl.BlockSpec((TH, E), lambda i, j: (j, 0)),
            pl.BlockSpec((1, E), lambda i, j: (0, 0)),
        ],
        out_specs=pl.BlockSpec((TM, E), lambda i, j: (i, 0)),
        scratch_shapes=[pltpu.VMEM((TM, E), _F32),      # down-proj accumulator
                        pltpu.VMEM((TM, E), _BF16)],    # cached normalized x
        input_output_aliases={0: 0},
        compiler_params=_cp(("parallel", "arbitrary")),
    )(x2, lp['post_norm'].reshape(1, E),
      lp['wu'].astype(_BF16), lp['bu'],
      lp['wg'].astype(_BF16), lp['bg'],
      lp['wd'].astype(_BF16), lp['bd'])


def final_norm(x_last, norm_w, eps=1e-6):
    B, E = x_last.shape
    kern = functools.partial(_final_norm_kernel, eps=eps)
    return pl.pallas_call(
        kern,
        out_shape=jax.ShapeDtypeStruct((B, E), _BF16),
        grid=(1,),
        in_specs=[pl.BlockSpec((B, E), lambda i: (0, 0)),
                  pl.BlockSpec((1, E), lambda i: (0, 0))],
        out_specs=pl.BlockSpec((B, E), lambda i: (0, 0)),
        compiler_params=_cp(("arbitrary",)),
    )(x_last, norm_w.reshape(1, E))


def lm_head(xn, w, b):
    B, E = xn.shape
    V = w.shape[1]
    TV = _tile(V, 2 * _weight_tile_target())  # lane-dense, 512/1024-wide target
    return pl.pallas_call(
        _lm_head_kernel,
        out_shape=jax.ShapeDtypeStruct((B, V), _F32),
        grid=(V // TV,),
        in_specs=[pl.BlockSpec((B, E), lambda j: (0, 0)),
                  pl.BlockSpec((E, TV), lambda j: (0, j)),
                  pl.BlockSpec((1, TV), lambda j: (0, j))],
        out_specs=pl.BlockSpec((B, TV), lambda j: (0, j)),
        compiler_params=_cp(("parallel",)),
    )(xn, w.astype(_BF16), b)


# --------------------------- model / parameters ----------------------------


def _init_linear(key, fan_in, fan_out):
    kw, kb = jax.random.split(key)
    w = jax.random.normal(kw, (fan_in, fan_out), _F32) / jnp.sqrt(float(fan_in))
    b = jax.random.normal(kb, (1, fan_out), _F32) * 0.01
    return w, b


def init_params(key, nheads, embed_dim, ffn_hidden, layers, vocab):
    keys = jax.random.split(key, 2 + layers)
    params = {
        'embedding': jax.random.normal(keys[0], (vocab, embed_dim), _F32) * 0.02,
        'final_norm': jnp.ones((embed_dim,), _F32),
        'layers': [],
    }
    wlm, blm = _init_linear(keys[1], embed_dim, vocab)
    params['lm_head_w'], params['lm_head_b'] = wlm, blm
    for l in range(layers):
        lk = jax.random.split(keys[2 + l], 7)
        wq, bq = _init_linear(lk[0], embed_dim, embed_dim)
        wk, bk = _init_linear(lk[1], embed_dim, embed_dim // 4)
        wv, bv = _init_linear(lk[2], embed_dim, embed_dim // 4)
        wo, bo = _init_linear(lk[3], embed_dim, embed_dim)
        wu, bu = _init_linear(lk[4], embed_dim, ffn_hidden)
        wg, bg = _init_linear(lk[5], embed_dim, ffn_hidden)
        wd, bd = _init_linear(lk[6], ffn_hidden, embed_dim)
        params['layers'].append(dict(
            pre_norm=jnp.ones((embed_dim,), _F32),
            post_norm=jnp.ones((embed_dim,), _F32),
            wq=wq, bq=bq, wk=wk, bk=bk, wv=wv, bv=bv, wo=wo, bo=bo,
            wu=wu, bu=bu, wg=wg, bg=bg, wd=wd, bd=bd))
    return params


def llama3_forward(tokens, params, nheads, head_dim, inference=False):
    assert nheads % 4 == 0, "GQA group size is nheads // 4"
    # TODO(synk): embedding gather has no clean Pallas equivalent here; done in JAX.
    X = params['embedding'][tokens].astype(_BF16)           # (B, T, E) bf16 residual
    B, T, E = X.shape
    Ek = E // 4
    nkv = nheads // 4
    N = B * T
    x2 = X.reshape(N, E)
    for lp in params['layers']:
        qkv = qkv_proj(x2, lp)                              # (N, E + 2*Ek) bf16
        # Head split / GQA layout prep in plain JAX (cheap at this size; see TODO above).
        q4 = qkv[:, :E].reshape(B, T, nheads, head_dim).transpose(0, 2, 1, 3)
        k4 = qkv[:, E:E + Ek].reshape(B, T, nkv, head_dim).transpose(0, 2, 1, 3)
        v4 = qkv[:, E + Ek:].reshape(B, T, nkv, head_dim).transpose(0, 2, 1, 3)
        ctx = attn_core(q4, k4, v4, nheads)                 # (B, H, T, D) bf16
        ctx2 = ctx.transpose(0, 2, 1, 3).reshape(N, E)
        x2 = out_proj(x2, ctx2, lp)                         # residual fused + aliased
        x2 = ffn_block(x2, lp)                              # norm + FFN + residual fused
    X = x2.reshape(B, T, E)
    xn = final_norm(X[:, -1, :], params['final_norm'])      # (B, E) bf16, norm hoisted
    logits = lm_head(xn, params['lm_head_w'], params['lm_head_b'])
    if inference:
        logits = jax.nn.softmax(logits, axis=-1)
    return logits


# --------------------------- pure-JAX reference ----------------------------


def reference_forward(tokens, params, nheads, head_dim, inference=False):
    hp = jax.lax.Precision.HIGHEST

    def rms(x, w):
        return x / jnp.sqrt(jnp.mean(x * x, axis=-1, keepdims=True) + 1e-6) * w

    X = params['embedding'][tokens]
    B, T, E = X.shape
    nkv = nheads // 4
    for lp in params['layers']:
        res = X
        Xn = rms(X, lp['pre_norm'])
        q = jnp.einsum('bte,ef->btf', Xn, lp['wq'], precision=hp) + lp['bq'][0]
        k = jnp.einsum('bte,ef->btf', Xn, lp['wk'], precision=hp) + lp['bk'][0]
        v = jnp.einsum('bte,ef->btf', Xn, lp['wv'], precision=hp) + lp['bv'][0]
        q = q.reshape(B, T, nheads, head_dim).transpose(0, 2, 1, 3)
        k = k.reshape(B, T, nkv, head_dim).transpose(0, 2, 1, 3)
        v = v.reshape(B, T, nkv, head_dim).transpose(0, 2, 1, 3)
        k = jnp.tile(k, (1, 4, 1, 1))
        v = jnp.tile(v, (1, 4, 1, 1))
        s = jnp.einsum('bhqd,bhkd->bhqk', q, k, precision=hp) / (nheads ** 0.5)
        mask = jnp.triu(jnp.full((T, T), -jnp.inf, _F32), k=1)
        p = jax.nn.softmax(s + mask, axis=-1)
        o = jnp.einsum('bhqk,bhkd->bhqd', p, v, precision=hp)
        o = o.transpose(0, 2, 1, 3).reshape(B, T, E)
        X = res + jnp.einsum('bte,ef->btf', o, lp['wo'], precision=hp) + lp['bo'][0]
        res = X
        Xn = rms(X, lp['post_norm'])
        up = jnp.einsum('bte,eh->bth', Xn, lp['wu'], precision=hp) + lp['bu'][0]
        gate = jnp.einsum('bte,eh->bth', Xn, lp['wg'], precision=hp) + lp['bg'][0]
        ff = jnp.einsum('bth,he->bte', jax.nn.silu(gate) * up, lp['wd'],
                        precision=hp) + lp['bd'][0]
        X = res + ff
    X = rms(X, params['final_norm'])
    logits = jnp.einsum('be,ev->bv', X[:, -1, :], params['lm_head_w'],
                        precision=hp) + params['lm_head_b'][0]
    if inference:
        logits = jax.nn.softmax(logits, axis=-1)
    return logits


# ---------------------------------- main -----------------------------------


if __name__ == "__main__":
    # Small config consistent with the module structure.
    NHEADS = 8
    EMBED_DIM = 64
    HEAD_DIM = EMBED_DIM // NHEADS
    FFN_HIDDEN = 128
    LAYERS = 2
    VOCAB = 256
    BATCH, TOKENS = 2, 8

    key = jax.random.PRNGKey(0)
    kp, kt = jax.random.split(key)
    params = init_params(kp, NHEADS, EMBED_DIM, FFN_HIDDEN, LAYERS, VOCAB)
    tokens = jax.random.randint(kt, (BATCH, TOKENS), 0, VOCAB, dtype=jnp.int32)

    fwd = jax.jit(functools.partial(llama3_forward, nheads=NHEADS, head_dim=HEAD_DIM))
    logits = jax.block_until_ready(fwd(tokens, params))

    ref = jax.block_until_ready(
        reference_forward(tokens, params, NHEADS, HEAD_DIM, inference=False))

    assert logits.shape == (BATCH, VOCAB), logits.shape
    assert np.all(np.isfinite(np.asarray(logits)))
    # Kernel path runs bf16 residual stream + bf16 matmul operands (f32 accumulation);
    # reference is full f32 HIGHEST precision, hence the loose tolerance.
    np.testing.assert_allclose(np.asarray(logits), np.asarray(ref),
                               rtol=5e-2, atol=1e-1)
    print("KERNEL_OK")
</pallas_src>

<mosaic_0001>
module attributes {stable_mosaic.version = 11 : i64} {
  func.func @_qkv_kernel(%arg0: i32, %arg1: i32, %arg2: memref<16x64xbf16, #tpu.memory_space<vmem>>, %arg3: memref<1x64xf32, #tpu.memory_space<vmem>>, %arg4: memref<64x96xbf16, #tpu.memory_space<vmem>>, %arg5: memref<1x96xf32, #tpu.memory_space<vmem>>, %arg6: memref<16x96xbf16, #tpu.memory_space<vmem>>, %arg7: memref<16x64xbf16, #tpu.memory_space<vmem>>) attributes {dimension_semantics = [#tpu.dimension_semantics<parallel>, #tpu.dimension_semantics<arbitrary>], iteration_bounds = array<i64: 1, 1>, scalar_prefetch = 0 : i64, scratch_operands = 1 : i64, tpu.core_type = #tpu.core_type<tc>, window_params = [{transform_indices = @transform_0, window_bounds = array<i64: 16, 64>}, {pipeline_mode = #tpu.pipeline_mode<synchronous>, transform_indices = @transform_1, window_bounds = array<i64: 1, 64>}, {transform_indices = @transform_2, window_bounds = array<i64: 64, 96>}, {transform_indices = @transform_3, window_bounds = array<i64: 1, 96>}, {transform_indices = @transform_4, window_bounds = array<i64: 16, 96>}]} {
    %c0_i32 = arith.constant 0 : i32
    %0 = arith.cmpi eq, %arg1, %c0_i32 : i32
    %1 = arith.extui %0 : i1 to i32
    %c0_i32_0 = arith.constant 0 : i32
    %2 = arith.cmpi ne, %1, %c0_i32_0 : i32
    scf.if %2 {
      %c0_8 = arith.constant 0 : index
      %c0_9 = arith.constant 0 : index
      %11 = vector.load %arg2[%c0_8, %c0_9] : memref<16x64xbf16, #tpu.memory_space<vmem>>, vector<16x64xbf16>
      %12 = arith.extf %11 : vector<16x64xbf16> to vector<16x64xf32>
      %13 = arith.mulf %12, %12 : vector<16x64xf32>
      %cst_10 = arith.constant dense<0.000000e+00> : vector<16xf32>
      %14 = vector.multi_reduction <add>, %13, %cst_10 [1] : vector<16x64xf32> to vector<16xf32>
      %15 = vector.shape_cast %14 : vector<16xf32> to vector<16x1xf32>
      %cst_11 = arith.constant 6.400000e+01 : f32
      %16 = vector.broadcast %cst_11 : f32 to vector<16x1xf32>
      %17 = arith.divf %15, %16 : vector<16x1xf32>
      %cst_12 = arith.constant 9.99999997E-7 : f32
      %18 = vector.broadcast %cst_12 : f32 to vector<16x1xf32>
      %19 = arith.addf %17, %18 : vector<16x1xf32>
      %20 = math.rsqrt %19 : vector<16x1xf32>
      %21 = vector.broadcast %20 : vector<16x1xf32> to vector<16x64xf32>
      %22 = arith.mulf %12, %21 : vector<16x64xf32>
      %c0_13 = arith.constant 0 : index
      %c0_14 = arith.constant 0 : index
      %23 = vector.load %arg3[%c0_13, %c0_14] : memref<1x64xf32, #tpu.memory_space<vmem>>, vector<1x64xf32>
      %24 = vector.broadcast %23 : vector<1x64xf32> to vector<16x64xf32>
      %25 = arith.mulf %22, %24 : vector<16x64xf32>
      %26 = arith.truncf %25 : vector<16x64xf32> to vector<16x64xbf16>
      %c0_15 = arith.constant 0 : index
      %c0_16 = arith.constant 0 : index
      %27 = vector.load %arg7[%c0_15, %c0_16] : memref<16x64xbf16, #tpu.memory_space<vmem>>, vector<16x64xbf16>
      tpu.vector_store %arg7[%c0_15, %c0_16], %26 {strides = array<i32>} : memref<16x64xbf16, #tpu.memory_space<vmem>>, vector<16x64xbf16>,
    } else {
    }
    %c0 = arith.constant 0 : index
    %c0_1 = arith.constant 0 : index
    %3 = vector.load %arg7[%c0, %c0_1] : memref<16x64xbf16, #tpu.memory_space<vmem>>, vector<16x64xbf16>
    %c0_2 = arith.constant 0 : index
    %c0_3 = arith.constant 0 : index
    %4 = vector.load %arg4[%c0_2, %c0_3] : memref<64x96xbf16, #tpu.memory_space<vmem>>, vector<64x96xbf16>
    %cst = arith.constant dense<0.000000e+00> : vector<16x96xf32>
    %5 = tpu.matmul %3, %4, %cst {dimension_numbers = #tpu.dot_dimension_numbers<[1], [0], [0], [1], [0, 0, 1, 1], [], []>} : vector<16x64xbf16>, vector<64x96xbf16>, vector<16x96xf32> -> vector<16x96xf32>
    %c0_4 = arith.constant 0 : index
    %c0_5 = arith.constant 0 : index
    %6 = vector.load %arg5[%c0_4, %c0_5] : memref<1x96xf32, #tpu.memory_space<vmem>>, vector<1x96xf32>
    %7 = vector.broadcast %6 : vector<1x96xf32> to vector<16x96xf32>
    %8 = arith.addf %5, %7 : vector<16x96xf32>
    %9 = arith.truncf %8 : vector<16x96xf32> to vector<16x96xbf16>
    %c0_6 = arith.constant 0 : index
    %c0_7 = arith.constant 0 : index
    %10 = vector.load %arg6[%c0_6, %c0_7] : memref<16x96xbf16, #tpu.memory_space<vmem>>, vector<16x96xbf16>
    tpu.vector_store %arg6[%c0_6, %c0_7], %9 {strides = array<i32>} : memref<16x96xbf16, #tpu.memory_space<vmem>>, vector<16x96xbf16>,
    return
  }
  func.func @transform_0(%arg0: i32, %arg1: i32) -> (i32, i32) {
    %c0_i32 = arith.constant 0 : i32
    %c0_i32_0 = arith.constant 0 : i32
    return %arg0, %c0_i32 : i32, i32
  }
  func.func @transform_1(%arg0: i32, %arg1: i32) -> (i32, i32) {
    %c0_i32 = arith.constant 0 : i32
    %c0_i32_0 = arith.constant 0 : i32
    %c0_i32_1 = arith.constant 0 : i32
    return %c0_i32, %c0_i32_0 : i32, i32
  }
  func.func @transform_2(%arg0: i32, %arg1: i32) -> (i32, i32) {
    %c0_i32 = arith.constant 0 : i32
    %c0_i32_0 = arith.constant 0 : i32
    return %c0_i32, %arg1 : i32, i32
  }
  func.func @transform_3(%arg0: i32, %arg1: i32) -> (i32, i32) {
    %c0_i32 = arith.constant 0 : i32
    %c0_i32_0 = arith.constant 0 : i32
    return %c0_i32, %arg1 : i32, i32
  }
  func.func @transform_4(%arg0: i32, %arg1: i32) -> (i32, i32) {
    %c0_i32 = arith.constant 0 : i32
    return %arg0, %arg1 : i32, i32
  }
}

module attributes {stable_mosaic.version = 11 : i64} {
  func.func @_oproj_kernel(%arg0: i32, %arg1: i32, %arg2: memref<16x64xbf16, #tpu.memory_space<vmem>>, %arg3: memref<16x64xbf16, #tpu.memory_space<vmem>>, %arg4: memref<64x64xbf16, #tpu.memory_space<vmem>>, %arg5: memref<1x64xf32, #tpu.memory_space<vmem>>, %arg6: memref<16x64xbf16, #tpu.memory_space<vmem>>) attributes {dimension_semantics = [#tpu.dimension_semantics<parallel>, #tpu.dimension_semantics<parallel>], iteration_bounds = array<i64: 1, 1>, scalar_prefetch = 0 : i64, scratch_operands = 0 : i64, tpu.core_type = #tpu.core_type<tc>, window_params = [{transform_indices = @transform_0, window_bounds = array<i64: 16, 64>}, {transform_indices = @transform_1, window_bounds = array<i64: 16, 64>}, {transform_indices = @transform_2, window_bounds = array<i64: 64, 64>}, {transform_indices = @transform_3, window_bounds = array<i64: 1, 64>}, {transform_indices = @transform_4, window_bounds = array<i64: 16, 64>}]} {
    %c0 = arith.constant 0 : index
    %c0_0 = arith.constant 0 : index
    %0 = vector.load %arg3[%c0, %c0_0] : memref<16x64xbf16, #tpu.memory_space<vmem>>, vector<16x64xbf16>
    %c0_1 = arith.constant 0 : index
    %c0_2 = arith.constant 0 : index
    %1 = vector.load %arg4[%c0_1, %c0_2] : memref<64x64xbf16, #tpu.memory_space<vmem>>, vector<64x64xbf16>
    %cst = arith.constant dense<0.000000e+00> : vector<16x64xf32>
    %2 = tpu.matmul %0, %1, %cst {dimension_numbers = #tpu.dot_dimension_numbers<[1], [0], [0], [1], [0, 0, 1, 1], [], []>} : vector<16x64xbf16>, vector<64x64xbf16>, vector<16x64xf32> -> vector<16x64xf32>
    %c0_3 = arith.constant 0 : index
    %c0_4 = arith.constant 0 : index
    %3 = vector.load %arg5[%c0_3, %c0_4] : memref<1x64xf32, #tpu.memory_space<vmem>>, vector<1x64xf32>
    %4 = vector.broadcast %3 : vector<1x64xf32> to vector<16x64xf32>
    %5 = arith.addf %2, %4 : vector<16x64xf32>
    %c0_5 = arith.constant 0 : index
    %c0_6 = arith.constant 0 : index
    %6 = vector.load %arg2[%c0_5, %c0_6] : memref<16x64xbf16, #tpu.memory_space<vmem>>, vector<16x64xbf16>
    %7 = arith.extf %6 : vector<16x64xbf16> to vector<16x64xf32>
    %8 = arith.addf %7, %5 : vector<16x64xf32>
    %9 = arith.truncf %8 : vector<16x64xf32> to vector<16x64xbf16>
    %c0_7 = arith.constant 0 : index
    %c0_8 = arith.constant 0 : index
    %10 = vector.load %arg6[%c0_7, %c0_8] : memref<16x64xbf16, #tpu.memory_space<vmem>>, vector<16x64xbf16>
    tpu.vector_store %arg6[%c0_7, %c0_8], %9 {strides = array<i32>} : memref<16x64xbf16, #tpu.memory_space<vmem>>, vector<16x64xbf16>,
    return
  }
  func.func @transform_0(%arg0: i32, %arg1: i32) -> (i32, i32) {
    %c0_i32 = arith.constant 0 : i32
    return %arg0, %arg1 : i32, i32
  }
  func.func @transform_1(%arg0: i32, %arg1: i32) -> (i32, i32) {
    %c0_i32 = arith.constant 0 : i32
    %c0_i32_0 = arith.constant 0 : i32
    return %arg0, %c0_i32 : i32, i32
  }
  func.func @transform_2(%arg0: i32, %arg1: i32) -> (i32, i32) {
    %c0_i32 = arith.constant 0 : i32
    %c0_i32_0 = arith.constant 0 : i32
    return %c0_i32, %arg1 : i32, i32
  }
  func.func @transform_3(%arg0: i32, %arg1: i32) -> (i32, i32) {
    %c0_i32 = arith.constant 0 : i32
    %c0_i32_0 = arith.constant 0 : i32
    return %c0_i32, %arg1 : i32, i32
  }
  func.func @transform_4(%arg0: i32, %arg1: i32) -> (i32, i32) {
    %c0_i32 = arith.constant 0 : i32
    return %arg0, %arg1 : i32, i32
  }
}

module attributes {stable_mosaic.version = 11 : i64} {
  func.func @_flash_attn_kernel(%arg0: i32, %arg1: i32, %arg2: i32, %arg3: i32, %arg4: memref<1x1x8x8xbf16, #tpu.memory_space<vmem>>, %arg5: memref<1x1x8x8xbf16, #tpu.memory_space<vmem>>, %arg6: memref<1x1x8x8xbf16, #tpu.memory_space<vmem>>, %arg7: memref<1x1x8x8xbf16, #tpu.memory_space<vmem>>, %arg8: memref<8x1xf32, #tpu.memory_space<vmem>>, %arg9: memref<8x1xf32, #tpu.memory_space<vmem>>, %arg10: memref<8x8xf32, #tpu.memory_space<vmem>>) attributes {dimension_semantics = [#tpu.dimension_semantics<parallel>, #tpu.dimension_semantics<parallel>, #tpu.dimension_semantics<parallel>, #tpu.dimension_semantics<arbitrary>], iteration_bounds = array<i64: 2, 8, 1, 1>, scalar_prefetch = 0 : i64, scratch_operands = 3 : i64, tpu.core_type = #tpu.core_type<tc>, window_params = [{transform_indices = @transform_0, window_bounds = array<i64: 1, 1, 8, 8>}, {transform_indices = @transform_1, window_bounds = array<i64: 1, 1, 8, 8>}, {transform_indices = @transform_2, window_bounds = array<i64: 1, 1, 8, 8>}, {transform_indices = @transform_3, window_bounds = array<i64: 1, 1, 8, 8>}]} {
    %c0_i32 = arith.constant 0 : i32
    %0 = arith.cmpi eq, %arg3, %c0_i32 : i32
    %1 = arith.extui %0 : i1 to i32
    %c0_i32_0 = arith.constant 0 : i32
    %2 = arith.cmpi ne, %1, %c0_i32_0 : i32
    scf.if %2 {
      %cst = arith.constant -1.000000e+30 : f32
      %12 = vector.broadcast %cst : f32 to vector<8x1xf32>
      %c0 = arith.constant 0 : index
      %c0_5 = arith.constant 0 : index
      %13 = vector.load %arg8[%c0, %c0_5] : memref<8x1xf32, #tpu.memory_space<vmem>>, vector<8x1xf32>
      tpu.vector_store %arg8[%c0, %c0_5], %12 {strides = array<i32>} : memref<8x1xf32, #tpu.memory_space<vmem>>, vector<8x1xf32>,
      %cst_6 = arith.constant 0.000000e+00 : f32
      %14 = vector.broadcast %cst_6 : f32 to vector<8x1xf32>
      %c0_7 = arith.constant 0 : index
      %c0_8 = arith.constant 0 : index
      %15 = vector.load %arg9[%c0_7, %c0_8] : memref<8x1xf32, #tpu.memory_space<vmem>>, vector<8x1xf32>
      tpu.vector_store %arg9[%c0_7, %c0_8], %14 {strides = array<i32>} : memref<8x1xf32, #tpu.memory_space<vmem>>, vector<8x1xf32>,
      %cst_9 = arith.constant 0.000000e+00 : f32
      %16 = vector.broadcast %cst_9 : f32 to vector<8x8xf32>
      %c0_10 = arith.constant 0 : index
      %c0_11 = arith.constant 0 : index
      %17 = vector.load %arg10[%c0_10, %c0_11] : memref<8x8xf32, #tpu.memory_space<vmem>>, vector<8x8xf32>
      tpu.vector_store %arg10[%c0_10, %c0_11], %16 {strides = array<i32>} : memref<8x8xf32, #tpu.memory_space<vmem>>, vector<8x8xf32>,
    } else {
    }
    %c8_i32 = arith.constant 8 : i32
    %3 = arith.muli %arg3, %c8_i32 : i32
    %c8_i32_1 = arith.constant 8 : i32
    %4 = arith.muli %arg2, %c8_i32_1 : i32
    %c7_i32 = arith.constant 7 : i32
    %5 = arith.addi %4, %c7_i32 : i32
    %6 = arith.cmpi sle, %3, %5 : i32
    %7 = arith.extui %6 : i1 to i32
    %c0_i32_2 = arith.constant 0 : i32
    %8 = arith.cmpi ne, %7, %c0_i32_2 : i32
    scf.if %8 {
      %c0 = arith.constant 0 : index
      %c0_5 = arith.constant 0 : index
      %c0_6 = arith.constant 0 : index
      %c0_7 = arith.constant 0 : index
      %12 = vector.load %arg4[%c0, %c0_5, %c0_6, %c0_7] : memref<1x1x8x8xbf16, #tpu.memory_space<vmem>>, vector<1x1x8x8xbf16>
      %13 = vector.shape_cast %12 : vector<1x1x8x8xbf16> to vector<8x8xbf16>
      %c0_8 = arith.constant 0 : index
      %c0_9 = arith.constant 0 : index
      %c0_10 = arith.constant 0 : index
      %c0_11 = arith.constant 0 : index
      %14 = vector.load %arg5[%c0_8, %c0_9, %c0_10, %c0_11] : memref<1x1x8x8xbf16, #tpu.memory_space<vmem>>, vector<1x1x8x8xbf16>
      %15 = vector.shape_cast %14 : vector<1x1x8x8xbf16> to vector<8x8xbf16>
      %c0_12 = arith.constant 0 : index
      %c0_13 = arith.constant 0 : index
      %c0_14 = arith.constant 0 : index
      %c0_15 = arith.constant 0 : index
      %16 = vector.load %arg6[%c0_12, %c0_13, %c0_14, %c0_15] : memref<1x1x8x8xbf16, #tpu.memory_space<vmem>>, vector<1x1x8x8xbf16>
      %17 = vector.shape_cast %16 : vector<1x1x8x8xbf16> to vector<8x8xbf16>
      %18 = tpu.transpose %15, [1, 0] : vector<8x8xbf16> -> vector<8x8xbf16>
      %cst = arith.constant dense<0.000000e+00> : vector<8x8xf32>
      %19 = tpu.matmul %13, %18, %cst {dimension_numbers = #tpu.dot_dimension_numbers<[1], [0], [0], [1], [0, 0, 1, 1], [], []>} : vector<8x8xbf16>, vector<8x8xbf16>, vector<8x8xf32> -> vector<8x8xf32>
      %cst_16 = arith.constant 0.353553385 : f32
      %20 = vector.broadcast %cst_16 : f32 to vector<8x8xf32>
      %21 = arith.mulf %19, %20 : vector<8x8xf32>
      %c8_i32_17 = arith.constant 8 : i32
      %22 = arith.muli %arg2, %c8_i32_17 : i32
      %23 = tpu.iota {dimensions = array<i32: 0>} : vector<8x8xi32>
      %24 = vector.broadcast %22 : i32 to vector<8x8xi32>
      %25 = arith.addi %24, %23 : vector<8x8xi32>
      %c8_i32_18 = arith.constant 8 : i32
      %26 = arith.muli %arg3, %c8_i32_18 : i32
      %27 = tpu.iota {dimensions = array<i32: 1>} : vector<8x8xi32>
      %28 = vector.broadcast %26 : i32 to vector<8x8xi32>
      %29 = arith.addi %28, %27 : vector<8x8xi32>
      %30 = arith.cmpi sgt, %29, %25 : vector<8x8xi32>
      %cst_19 = arith.constant -1.000000e+30 : f32
      %cst_20 = arith.constant 0.000000e+00 : f32
      %31 = vector.broadcast %cst_19 : f32 to vector<8x8xf32>
      %32 = vector.broadcast %cst_20 : f32 to vector<8x8xf32>
      %33 = arith.select %30, %31, %32 : vector<8x8xi1>, vector<8x8xf32>
      %34 = arith.addf %21, %33 : vector<8x8xf32>
      %c0_21 = arith.constant 0 : index
      %c0_22 = arith.constant 0 : index
      %35 = vector.load %arg8[%c0_21, %c0_22] : memref<8x1xf32, #tpu.memory_space<vmem>>, vector<8x1xf32>
      %cst_23 = arith.constant dense<0xFF800000> : vector<8xf32>
      %36 = vector.multi_reduction <maximumf>, %34, %cst_23 [1] : vector<8x8xf32> to vector<8xf32>
      %37 = vector.shape_cast %36 : vector<8xf32> to vector<8x1xf32>
      %38 = arith.maximumf %35, %37 : vector<8x1xf32>
      %39 = arith.subf %35, %38 : vector<8x1xf32>
      %40 = math.exp %39 : vector<8x1xf32>
      %41 = vector.broadcast %38 : vector<8x1xf32> to vector<8x8xf32>
      %42 = arith.subf %34, %41 : vector<8x8xf32>
      %43 = math.exp %42 : vector<8x8xf32>
      %c0_24 = arith.constant 0 : index
      %c0_25 = arith.constant 0 : index
      %44 = vector.load %arg9[%c0_24, %c0_25] : memref<8x1xf32, #tpu.memory_space<vmem>>, vector<8x1xf32>
      %45 = arith.mulf %40, %44 : vector<8x1xf32>
      %cst_26 = arith.constant dense<0.000000e+00> : vector<8xf32>
      %46 = vector.multi_reduction <add>, %43, %cst_26 [1] : vector<8x8xf32> to vector<8xf32>
      %47 = vector.shape_cast %46 : vector<8xf32> to vector<8x1xf32>
      %48 = arith.addf %45, %47 : vector<8x1xf32>
      %c0_27 = arith.constant 0 : index
      %c0_28 = arith.constant 0 : index
      %49 = vector.load %arg9[%c0_27, %c0_28] : memref<8x1xf32, #tpu.memory_space<vmem>>, vector<8x1xf32>
      tpu.vector_store %arg9[%c0_27, %c0_28], %48 {strides = array<i32>} : memref<8x1xf32, #tpu.memory_space<vmem>>, vector<8x1xf32>,
      %c0_29 = arith.constant 0 : index
      %c0_30 = arith.constant 0 : index
      %50 = vector.load %arg10[%c0_29, %c0_30] : memref<8x8xf32, #tpu.memory_space<vmem>>, vector<8x8xf32>
      %51 = vector.broadcast %40 : vector<8x1xf32> to vector<8x8xf32>
      %52 = arith.mulf %51, %50 : vector<8x8xf32>
      %53 = arith.truncf %43 : vector<8x8xf32> to vector<8x8xbf16>
      %cst_31 = arith.constant dense<0.000000e+00> : vector<8x8xf32>
      %54 = tpu.matmul %53, %17, %cst_31 {dimension_numbers = #tpu.dot_dimension_numbers<[1], [0], [0], [1], [0, 0, 1, 1], [], []>} : vector<8x8xbf16>, vector<8x8xbf16>, vector<8x8xf32> -> vector<8x8xf32>
      %55 = arith.addf %52, %54 : vector<8x8xf32>
      %c0_32 = arith.constant 0 : index
      %c0_33 = arith.constant 0 : index
      %56 = vector.load %arg10[%c0_32, %c0_33] : memref<8x8xf32, #tpu.memory_space<vmem>>, vector<8x8xf32>
      tpu.vector_store %arg10[%c0_32, %c0_33], %55 {strides = array<i32>} : memref<8x8xf32, #tpu.memory_space<vmem>>, vector<8x8xf32>,
      %c0_34 = arith.constant 0 : index
      %c0_35 = arith.constant 0 : index
      %57 = vector.load %arg8[%c0_34, %c0_35] : memref<8x1xf32, #tpu.memory_space<vmem>>, vector<8x1xf32>
      tpu.vector_store %arg8[%c0_34, %c0_35], %38 {strides = array<i32>} : memref<8x1xf32, #tpu.memory_space<vmem>>, vector<8x1xf32>,
    } else {
    }
    %c0_i32_3 = arith.constant 0 : i32
    %9 = arith.cmpi eq, %arg3, %c0_i32_3 : i32
    %10 = arith.extui %9 : i1 to i32
    %c0_i32_4 = arith.constant 0 : i32
    %11 = arith.cmpi ne, %10, %c0_i32_4 : i32
    scf.if %11 {
      %c0 = arith.constant 0 : index
      %c0_5 = arith.constant 0 : index
      %12 = vector.load %arg10[%c0, %c0_5] : memref<8x8xf32, #tpu.memory_space<vmem>>, vector<8x8xf32>
      %c0_6 = arith.constant 0 : index
      %c0_7 = arith.constant 0 : index
      %13 = vector.load %arg9[%c0_6, %c0_7] : memref<8x1xf32, #tpu.memory_space<vmem>>, vector<8x1xf32>
      %14 = tpu.reciprocal %13 {approx = true} : vector<8x1xf32> -> vector<8x1xf32>
      %15 = vector.broadcast %14 : vector<8x1xf32> to vector<8x8xf32>
      %16 = arith.mulf %12, %15 : vector<8x8xf32>
      %17 = arith.truncf %16 : vector<8x8xf32> to vector<8x8xbf16>
      %c0_8 = arith.constant 0 : index
      %c0_9 = arith.constant 0 : index
      %c0_10 = arith.constant 0 : index
      %c0_11 = arith.constant 0 : index
      %18 = vector.load %arg7[%c0_8, %c0_9, %c0_10, %c0_11] : memref<1x1x8x8xbf16, #tpu.memory_space<vmem>>, vector<1x1x8x8xbf16>
      %19 = vector.shape_cast %18 : vector<1x1x8x8xbf16> to vector<8x8xbf16>
      %20 = vector.shape_cast %17 : vector<8x8xbf16> to vector<1x1x8x8xbf16>
      tpu.vector_store %arg7[%c0_8, %c0_9, %c0_10, %c0_11], %20 {strides = array<i32>} : memref<1x1x8x8xbf16, #tpu.memory_space<vmem>>, vector<1x1x8x8xbf16>,
    } else {
    }
    return
  }
  func.func @transform_0(%arg0: i32, %arg1: i32, %arg2: i32, %arg3: i32) -> (i32, i32, i32, i32) {
    %c0_i32 = arith.constant 0 : i32
    %c0_i32_0 = arith.constant 0 : i32
    return %arg0, %arg1, %arg2, %c0_i32 : i32, i32, i32, i32
  }
  func.func @transform_1(%arg0: i32, %arg1: i32, %arg2: i32, %arg3: i32) -> (i32, i32, i32, i32) {
    %c2_i32 = arith.constant 2 : i32
    %0 = arith.remsi %arg1, %c2_i32 : i32
    %c0_i32 = arith.constant 0 : i32
    %c0_i32_0 = arith.constant 0 : i32
    return %arg0, %0, %arg3, %c0_i32 : i32, i32, i32, i32
  }
  func.func @transform_2(%arg0: i32, %arg1: i32, %arg2: i32, %arg3: i32) -> (i32, i32, i32, i32) {
    %c2_i32 = arith.constant 2 : i32
    %0 = arith.remsi %arg1, %c2_i32 : i32
    %c0_i32 = arith.constant 0 : i32
    %c0_i32_0 = arith.constant 0 : i32
    return %arg0, %0, %arg3, %c0_i32 : i32, i32, i32, i32
  }
  func.func @transform_3(%arg0: i32, %arg1: i32, %arg2: i32, %arg3: i32) -> (i32, i32, i32, i32) {
    %c0_i32 = arith.constant 0 : i32
    %c0_i32_0 = arith.constant 0 : i32
    return %arg0, %arg1, %arg2, %c0_i32 : i32, i32, i32, i32
  }
}

module attributes {stable_mosaic.version = 11 : i64} {
  func.func @_ffn_kernel(%arg0: i32, %arg1: i32, %arg2: memref<16x64xbf16, #tpu.memory_space<vmem>>, %arg3: memref<1x64xf32, #tpu.memory_space<vmem>>, %arg4: memref<64x128xbf16, #tpu.memory_space<vmem>>, %arg5: memref<1x128xf32, #tpu.memory_space<vmem>>, %arg6: memref<64x128xbf16, #tpu.memory_space<vmem>>, %arg7: memref<1x128xf32, #tpu.memory_space<vmem>>, %arg8: memref<128x64xbf16, #tpu.memory_space<vmem>>, %arg9: memref<1x64xf32, #tpu.memory_space<vmem>>, %arg10: memref<16x64xbf16, #tpu.memory_space<vmem>>, %arg11: memref<16x64xf32, #tpu.memory_space<vmem>>, %arg12: memref<16x64xbf16, #tpu.memory_space<vmem>>) attributes {dimension_semantics = [#tpu.dimension_semantics<parallel>, #tpu.dimension_semantics<arbitrary>], iteration_bounds = array<i64: 1, 1>, scalar_prefetch = 0 : i64, scratch_operands = 2 : i64, tpu.core_type = #tpu.core_type<tc>, window_params = [{transform_indices = @transform_0, window_bounds = array<i64: 16, 64>}, {pipeline_mode = #tpu.pipeline_mode<synchronous>, transform_indices = @transform_1, window_bounds = array<i64: 1, 64>}, {transform_indices = @transform_2, window_bounds = array<i64: 64, 128>}, {transform_indices = @transform_3, window_bounds = array<i64: 1, 128>}, {transform_indices = @transform_4, window_bounds = array<i64: 64, 128>}, {transform_indices = @transform_5, window_bounds = array<i64: 1, 128>}, {transform_indices = @transform_6, window_bounds = array<i64: 128, 64>}, {pipeline_mode = #tpu.pipeline_mode<synchronous>, transform_indices = @transform_7, window_bounds = array<i64: 1, 64>}, {transform_indices = @transform_8, window_bounds = array<i64: 16, 64>}]} {
    %c0_i32 = arith.constant 0 : i32
    %0 = arith.cmpi eq, %arg1, %c0_i32 : i32
    %1 = arith.extui %0 : i1 to i32
    %c0_i32_0 = arith.constant 0 : i32
    %2 = arith.cmpi ne, %1, %c0_i32_0 : i32
    scf.if %2 {
      %c0_22 = arith.constant 0 : index
      %c0_23 = arith.constant 0 : index
      %31 = vector.load %arg2[%c0_22, %c0_23] : memref<16x64xbf16, #tpu.memory_space<vmem>>, vector<16x64xbf16>
      %32 = arith.extf %31 : vector<16x64xbf16> to vector<16x64xf32>
      %33 = arith.mulf %32, %32 : vector<16x64xf32>
      %cst_24 = arith.constant dense<0.000000e+00> : vector<16xf32>
      %34 = vector.multi_reduction <add>, %33, %cst_24 [1] : vector<16x64xf32> to vector<16xf32>
      %35 = vector.shape_cast %34 : vector<16xf32> to vector<16x1xf32>
      %cst_25 = arith.constant 6.400000e+01 : f32
      %36 = vector.broadcast %cst_25 : f32 to vector<16x1xf32>
      %37 = arith.divf %35, %36 : vector<16x1xf32>
      %cst_26 = arith.constant 9.99999997E-7 : f32
      %38 = vector.broadcast %cst_26 : f32 to vector<16x1xf32>
      %39 = arith.addf %37, %38 : vector<16x1xf32>
      %40 = math.rsqrt %39 : vector<16x1xf32>
      %41 = vector.broadcast %40 : vector<16x1xf32> to vector<16x64xf32>
      %42 = arith.mulf %32, %41 : vector<16x64xf32>
      %c0_27 = arith.constant 0 : index
      %c0_28 = arith.constant 0 : index
      %43 = vector.load %arg3[%c0_27, %c0_28] : memref<1x64xf32, #tpu.memory_space<vmem>>, vector<1x64xf32>
      %44 = vector.broadcast %43 : vector<1x64xf32> to vector<16x64xf32>
      %45 = arith.mulf %42, %44 : vector<16x64xf32>
      %46 = arith.truncf %45 : vector<16x64xf32> to vector<16x64xbf16>
      %c0_29 = arith.constant 0 : index
      %c0_30 = arith.constant 0 : index
      %47 = vector.load %arg12[%c0_29, %c0_30] : memref<16x64xbf16, #tpu.memory_space<vmem>>, vector<16x64xbf16>
      tpu.vector_store %arg12[%c0_29, %c0_30], %46 {strides = array<i32>} : memref<16x64xbf16, #tpu.memory_space<vmem>>, vector<16x64xbf16>,
      %cst_31 = arith.constant 0.000000e+00 : f32
      %48 = vector.broadcast %cst_31 : f32 to vector<16x64xf32>
      %c0_32 = arith.constant 0 : index
      %c0_33 = arith.constant 0 : index
      %49 = vector.load %arg11[%c0_32, %c0_33] : memref<16x64xf32, #tpu.memory_space<vmem>>, vector<16x64xf32>
      tpu.vector_store %arg11[%c0_32, %c0_33], %48 {strides = array<i32>} : memref<16x64xf32, #tpu.memory_space<vmem>>, vector<16x64xf32>,
    } else {
    }
    %c0 = arith.constant 0 : index
    %c0_1 = arith.constant 0 : index
    %3 = vector.load %arg12[%c0, %c0_1] : memref<16x64xbf16, #tpu.memory_space<vmem>>, vector<16x64xbf16>
    %c0_2 = arith.constant 0 : index
    %c0_3 = arith.constant 0 : index
    %4 = vector.load %arg4[%c0_2, %c0_3] : memref<64x128xbf16, #tpu.memory_space<vmem>>, vector<64x128xbf16>
    %cst = arith.constant dense<0.000000e+00> : vector<16x128xf32>
    %5 = tpu.matmul %3, %4, %cst {dimension_numbers = #tpu.dot_dimension_numbers<[1], [0], [0], [1], [0, 0, 1, 1], [], []>} : vector<16x64xbf16>, vector<64x128xbf16>, vector<16x128xf32> -> vector<16x128xf32>
    %c0_4 = arith.constant 0 : index
    %c0_5 = arith.constant 0 : index
    %6 = vector.load %arg5[%c0_4, %c0_5] : memref<1x128xf32, #tpu.memory_space<vmem>>, vector<1x128xf32>
    %7 = vector.broadcast %6 : vector<1x128xf32> to vector<16x128xf32>
    %8 = arith.addf %5, %7 : vector<16x128xf32>
    %c0_6 = arith.constant 0 : index
    %c0_7 = arith.constant 0 : index
    %9 = vector.load %arg6[%c0_6, %c0_7] : memref<64x128xbf16, #tpu.memory_space<vmem>>, vector<64x128xbf16>
    %cst_8 = arith.constant dense<0.000000e+00> : vector<16x128xf32>
    %10 = tpu.matmul %3, %9, %cst_8 {dimension_numbers = #tpu.dot_dimension_numbers<[1], [0], [0], [1], [0, 0, 1, 1], [], []>} : vector<16x64xbf16>, vector<64x128xbf16>, vector<16x128xf32> -> vector<16x128xf32>
    %c0_9 = arith.constant 0 : index
    %c0_10 = arith.constant 0 : index
    %11 = vector.load %arg7[%c0_9, %c0_10] : memref<1x128xf32, #tpu.memory_space<vmem>>, vector<1x128xf32>
    %12 = vector.broadcast %11 : vector<1x128xf32> to vector<16x128xf32>
    %13 = arith.addf %10, %12 : vector<16x128xf32>
    %cst_11 = arith.constant 0.000000e+00 : f32
    %14 = vector.broadcast %cst_11 : f32 to vector<16x128xf32>
    %15 = arith.subf %14, %13 : vector<16x128xf32>
    %16 = math.exp %15 : vector<16x128xf32>
    %cst_12 = arith.constant 1.000000e+00 : f32
    %17 = vector.broadcast %cst_12 : f32 to vector<16x128xf32>
    %18 = arith.addf %17, %16 : vector<16x128xf32>
    %19 = tpu.reciprocal %18 {approx = true} : vector<16x128xf32> -> vector<16x128xf32>
    %20 = arith.mulf %13, %19 : vector<16x128xf32>
    %21 = arith.mulf %20, %8 : vector<16x128xf32>
    %22 = arith.truncf %21 : vector<16x128xf32> to vector<16x128xbf16>
    %c0_13 = arith.constant 0 : index
    %c0_14 = arith.constant 0 : index
    %23 = vector.load %arg11[%c0_13, %c0_14] : memref<16x64xf32, #tpu.memory_space<vmem>>, vector<16x64xf32>
    %c0_15 = arith.constant 0 : index
    %c0_16 = arith.constant 0 : index
    %24 = vector.load %arg8[%c0_15, %c0_16] : memref<128x64xbf16, #tpu.memory_space<vmem>>, vector<128x64xbf16>
    %cst_17 = arith.constant dense<0.000000e+00> : vector<16x64xf32>
    %25 = tpu.matmul %22, %24, %cst_17 {dimension_numbers = #tpu.dot_dimension_numbers<[1], [0], [0], [1], [0, 0, 1, 1], [], []>} : vector<16x128xbf16>, vector<128x64xbf16>, vector<16x64xf32> -> vector<16x64xf32>
    %26 = arith.addf %23, %25 : vector<16x64xf32>
    %c0_18 = arith.constant 0 : index
    %c0_19 = arith.constant 0 : index
    %27 = vector.load %arg11[%c0_18, %c0_19] : memref<16x64xf32, #tpu.memory_space<vmem>>, vector<16x64xf32>
    tpu.vector_store %arg11[%c0_18, %c0_19], %26 {strides = array<i32>} : memref<16x64xf32, #tpu.memory_space<vmem>>, vector<16x64xf32>,
    %c0_i32_20 = arith.constant 0 : i32
    %28 = arith.cmpi eq, %arg1, %c0_i32_20 : i32
    %29 = arith.extui %28 : i1 to i32
    %c0_i32_21 = arith.constant 0 : i32
    %30 = arith.cmpi ne, %29, %c0_i32_21 : i32
    scf.if %30 {
      %c0_22 = arith.constant 0 : index
      %c0_23 = arith.constant 0 : index
      %31 = vector.load %arg2[%c0_22, %c0_23] : memref<16x64xbf16, #tpu.memory_space<vmem>>, vector<16x64xbf16>
      %32 = arith.extf %31 : vector<16x64xbf16> to vector<16x64xf32>
      %c0_24 = arith.constant 0 : index
      %c0_25 = arith.constant 0 : index
      %33 = vector.load %arg11[%c0_24, %c0_25] : memref<16x64xf32, #tpu.memory_space<vmem>>, vector<16x64xf32>
      %34 = arith.addf %32, %33 : vector<16x64xf32>
      %c0_26 = arith.constant 0 : index
      %c0_27 = arith.constant 0 : index
      %35 = vector.load %arg9[%c0_26, %c0_27] : memref<1x64xf32, #tpu.memory_space<vmem>>, vector<1x64xf32>
      %36 = vector.broadcast %35 : vector<1x64xf32> to vector<16x64xf32>
      %37 = arith.addf %34, %36 : vector<16x64xf32>
      %38 = arith.truncf %37 : vector<16x64xf32> to vector<16x64xbf16>
      %c0_28 = arith.constant 0 : index
      %c0_29 = arith.constant 0 : index
      %39 = vector.load %arg10[%c0_28, %c0_29] : memref<16x64xbf16, #tpu.memory_space<vmem>>, vector<16x64xbf16>
      tpu.vector_store %arg10[%c0_28, %c0_29], %38 {strides = array<i32>} : memref<16x64xbf16, #tpu.memory_space<vmem>>, vector<16x64xbf16>,
    } else {
    }
    return
  }
  func.func @transform_0(%arg0: i32, %arg1: i32) -> (i32, i32) {
    %c0_i32 = arith.constant 0 : i32
    %c0_i32_0 = arith.constant 0 : i32
    return %arg0, %c0_i32 : i32, i32
  }
  func.func @transform_1(%arg0: i32, %arg1: i32) -> (i32, i32) {
    %c0_i32 = arith.constant 0 : i32
    %c0_i32_0 = arith.constant 0 : i32
    %c0_i32_1 = arith.constant 0 : i32
    return %c0_i32, %c0_i32_0 : i32, i32
  }
  func.func @transform_2(%arg0: i32, %arg1: i32) -> (i32, i32) {
    %c0_i32 = arith.constant 0 : i32
    %c0_i32_0 = arith.constant 0 : i32
    return %c0_i32, %arg1 : i32, i32
  }
  func.func @transform_3(%arg0: i32, %arg1: i32) -> (i32, i32) {
    %c0_i32 = arith.constant 0 : i32
    %c0_i32_0 = arith.constant 0 : i32
    return %c0_i32, %arg1 : i32, i32
  }
  func.func @transform_4(%arg0: i32, %arg1: i32) -> (i32, i32) {
    %c0_i32 = arith.constant 0 : i32
    %c0_i32_0 = arith.constant 0 : i32
    return %c0_i32, %arg1 : i32, i32
  }
  func.func @transform_5(%arg0: i32, %arg1: i32) -> (i32, i32) {
    %c0_i32 = arith.constant 0 : i32
    %c0_i32_0 = arith.constant 0 : i32
    return %c0_i32, %arg1 : i32, i32
  }
  func.func @transform_6(%arg0: i32, %arg1: i32) -> (i32, i32) {
    %c0_i32 = arith.constant 0 : i32
    %c0_i32_0 = arith.constant 0 : i32
    return %arg1, %c0_i32 : i32, i32
  }
  func.func @transform_7(%arg0: i32, %arg1: i32) -> (i32, i32) {
    %c0_i32 = arith.constant 0 : i32
    %c0_i32_0 = arith.constant 0 : i32
    %c0_i32_1 = arith.constant 0 : i32
    return %c0_i32, %c0_i32_0 : i32, i32
  }
  func.func @transform_8(%arg0: i32, %arg1: i32) -> (i32, i32) {
    %c0_i32 = arith.constant 0 : i32
    %c0_i32_0 = arith.constant 0 : i32
    return %arg0, %c0_i32 : i32, i32
  }
}

module attributes {stable_mosaic.version = 11 : i64} {
  func.func @_final_norm_kernel(%arg0: i32, %arg1: memref<2x64xbf16, #tpu.memory_space<vmem>>, %arg2: memref<1x64xf32, #tpu.memory_space<vmem>>, %arg3: memref<2x64xbf16, #tpu.memory_space<vmem>>) attributes {dimension_semantics = [#tpu.dimension_semantics<arbitrary>], iteration_bounds = array<i64: 1>, scalar_prefetch = 0 : i64, scratch_operands = 0 : i64, tpu.core_type = #tpu.core_type<tc>, window_params = [{pipeline_mode = #tpu.pipeline_mode<synchronous>, transform_indices = @transform_0, window_bounds = array<i64: 2, 64>}, {pipeline_mode = #tpu.pipeline_mode<synchronous>, transform_indices = @transform_1, window_bounds = array<i64: 1, 64>}, {pipeline_mode = #tpu.pipeline_mode<synchronous>, transform_indices = @transform_2, window_bounds = array<i64: 2, 64>}]} {
    %c0 = arith.constant 0 : index
    %c0_0 = arith.constant 0 : index
    %0 = vector.load %arg1[%c0, %c0_0] : memref<2x64xbf16, #tpu.memory_space<vmem>>, vector<2x64xbf16>
    %1 = arith.extf %0 : vector<2x64xbf16> to vector<2x64xf32>
    %2 = arith.mulf %1, %1 : vector<2x64xf32>
    %cst = arith.constant dense<0.000000e+00> : vector<2xf32>
    %3 = vector.multi_reduction <add>, %2, %cst [1] : vector<2x64xf32> to vector<2xf32>
    %4 = vector.shape_cast %3 : vector<2xf32> to vector<2x1xf32>
    %cst_1 = arith.constant 6.400000e+01 : f32
    %5 = vector.broadcast %cst_1 : f32 to vector<2x1xf32>
    %6 = arith.divf %4, %5 : vector<2x1xf32>
    %cst_2 = arith.constant 9.99999997E-7 : f32
    %7 = vector.broadcast %cst_2 : f32 to vector<2x1xf32>
    %8 = arith.addf %6, %7 : vector<2x1xf32>
    %9 = math.rsqrt %8 : vector<2x1xf32>
    %10 = vector.broadcast %9 : vector<2x1xf32> to vector<2x64xf32>
    %11 = arith.mulf %1, %10 : vector<2x64xf32>
    %c0_3 = arith.constant 0 : index
    %c0_4 = arith.constant 0 : index
    %12 = vector.load %arg2[%c0_3, %c0_4] : memref<1x64xf32, #tpu.memory_space<vmem>>, vector<1x64xf32>
    %13 = vector.broadcast %12 : vector<1x64xf32> to vector<2x64xf32>
    %14 = arith.mulf %11, %13 : vector<2x64xf32>
    %15 = arith.truncf %14 : vector<2x64xf32> to vector<2x64xbf16>
    %c0_5 = arith.constant 0 : index
    %c0_6 = arith.constant 0 : index
    %16 = vector.load %arg3[%c0_5, %c0_6] : memref<2x64xbf16, #tpu.memory_space<vmem>>, vector<2x64xbf16>
    tpu.vector_store %arg3[%c0_5, %c0_6], %15 {strides = array<i32>} : memref<2x64xbf16, #tpu.memory_space<vmem>>, vector<2x64xbf16>,
    return
  }
  func.func @transform_0(%arg0: i32) -> (i32, i32) {
    %c0_i32 = arith.constant 0 : i32
    %c0_i32_0 = arith.constant 0 : i32
    %c0_i32_1 = arith.constant 0 : i32
    return %c0_i32, %c0_i32_0 : i32, i32
  }
  func.func @transform_1(%arg0: i32) -> (i32, i32) {
    %c0_i32 = arith.constant 0 : i32
    %c0_i32_0 = arith.constant 0 : i32
    %c0_i32_1 = arith.constant 0 : i32
    return %c0_i32, %c0_i32_0 : i32, i32
  }
  func.func @transform_2(%arg0: i32) -> (i32, i32) {
    %c0_i32 = arith.constant 0 : i32
    %c0_i32_0 = arith.constant 0 : i32
    %c0_i32_1 = arith.constant 0 : i32
    return %c0_i32, %c0_i32_0 : i32, i32
  }
}

module attributes {stable_mosaic.version = 11 : i64} {
  func.func @_lm_head_kernel(%arg0: i32, %arg1: memref<2x64xbf16, #tpu.memory_space<vmem>>, %arg2: memref<64x256xbf16, #tpu.memory_space<vmem>>, %arg3: memref<1x256xf32, #tpu.memory_space<vmem>>, %arg4: memref<2x256xf32, #tpu.memory_space<vmem>>) attributes {dimension_semantics = [#tpu.dimension_semantics<parallel>], iteration_bounds = array<i64: 1>, scalar_prefetch = 0 : i64, scratch_operands = 0 : i64, tpu.core_type = #tpu.core_type<tc>, window_params = [{pipeline_mode = #tpu.pipeline_mode<synchronous>, transform_indices = @transform_0, window_bounds = array<i64: 2, 64>}, {transform_indices = @transform_1, window_bounds = array<i64: 64, 256>}, {transform_indices = @transform_2, window_bounds = array<i64: 1, 256>}, {transform_indices = @transform_3, window_bounds = array<i64: 2, 256>}]} {
    %c0 = arith.constant 0 : index
    %c0_0 = arith.constant 0 : index
    %0 = vector.load %arg1[%c0, %c0_0] : memref<2x64xbf16, #tpu.memory_space<vmem>>, vector<2x64xbf16>
    %c0_1 = arith.constant 0 : index
    %c0_2 = arith.constant 0 : index
    %1 = vector.load %arg2[%c0_1, %c0_2] : memref<64x256xbf16, #tpu.memory_space<vmem>>, vector<64x256xbf16>
    %cst = arith.constant dense<0.000000e+00> : vector<2x256xf32>
    %2 = tpu.matmul %0, %1, %cst {dimension_numbers = #tpu.dot_dimension_numbers<[1], [0], [0], [1], [0, 0, 1, 1], [], []>} : vector<2x64xbf16>, vector<64x256xbf16>, vector<2x256xf32> -> vector<2x256xf32>
    %c0_3 = arith.constant 0 : index
    %c0_4 = arith.constant 0 : index
    %3 = vector.load %arg3[%c0_3, %c0_4] : memref<1x256xf32, #tpu.memory_space<vmem>>, vector<1x256xf32>
    %4 = vector.broadcast %3 : vector<1x256xf32> to vector<2x256xf32>
    %5 = arith.addf %2, %4 : vector<2x256xf32>
    %c0_5 = arith.constant 0 : index
    %c0_6 = arith.constant 0 : index
    %6 = vector.load %arg4[%c0_5, %c0_6] : memref<2x256xf32, #tpu.memory_space<vmem>>, vector<2x256xf32>
    tpu.vector_store %arg4[%c0_5, %c0_6], %5 {strides = array<i32>} : memref<2x256xf32, #tpu.memory_space<vmem>>, vector<2x256xf32>,
    return
  }
  func.func @transform_0(%arg0: i32) -> (i32, i32) {
    %c0_i32 = arith.constant 0 : i32
    %c0_i32_0 = arith.constant 0 : i32
    %c0_i32_1 = arith.constant 0 : i32
    return %c0_i32, %c0_i32_0 : i32, i32
  }
  func.func @transform_1(%arg0: i32) -> (i32, i32) {
    %c0_i32 = arith.constant 0 : i32
    %c0_i32_0 = arith.constant 0 : i32
    return %c0_i32, %arg0 : i32, i32
  }
  func.func @transform_2(%arg0: i32) -> (i32, i32) {
    %c0_i32 = arith.constant 0 : i32
    %c0_i32_0 = arith.constant 0 : i32
    return %c0_i32, %arg0 : i32, i32
  }
  func.func @transform_3(%arg0: i32) -> (i32, i32) {
    %c0_i32 = arith.constant 0 : i32
    %c0_i32_0 = arith.constant 0 : i32
    return %c0_i32, %arg0 : i32, i32
  }
}

</mosaic_0001>

<bundles_post_ra>
// kernel: llama3_forward.12
= control target key start
LH: loop header
LB: loop body
LE: loop exit
PB: predicated region body
PF: predicated region fallthrough
CT: control target
= control target key end

     0   :  { %vm61_vm0 = vcmask 523264   ;;  %vm87_vm1 = vcmask 519168   ;;  %s177_s2 = inlined_call_operand.vmem [shape: bf16[64,64], index: 2, kind: input, shape index: {}]   ;;  %s178_s3 = inlined_call_operand.vmem [shape: f32[1,64], index: 3, kind: input, shape index: {}]   ;;  %s179_s1 = inlined_call_operand.vmem [shape: bf16[16,64], index: 1, kind: input, shape index: {}]   ;;  %s180_s0 = inlined_call_operand.vmem [shape: bf16[16,64], index: 0, kind: input, shape index: {}, may-alias: {0,4}]   ;;  %s181_s4 = inlined_call_operand.vmem [shape: bf16[16,64], index: 4, kind: output, shape index: {}, may-alias: {0,4}]  }
   0x1   :  { %v119_v0 = vld [vmem:[%s177_s2 + $0x18] sm:$0xff]  ;;  %v118_v1 = vld [vmem:[%s177_s2 + $0x10] sm:$0xff]  ;;  %v117_v2 = vld [vmem:[%s177_s2 + $0x8] sm:$0xff] }
   0x2   :  { %69 = vmatpush.bf16.msra.mxu0 %v119_v0  ;;  %v116_v3 = vld [vmem:[%s177_s2] sm:$0xff] }
   0x3   :  { %v115_v4 = vld [vmem:[%s179_s1] sm:$0xff] }
   0x4   :  { %v121_v5 = vld [vmem:[%s180_s0] sm:$0xff]  }
   0x5   :  { %v124_v6 = vld [vmem:[%s178_s3] ss:$0 sm:$0xff]  ;;  %v122_v7 = vunpack.c.l.bf16 %v121_v5  ;;  %v123_v12 = vunpack.c.h.bf16 %v121_v5 }
   0x6   :  { %70 = vmatpush.bf16.msra.mxu0 %v118_v1 }
   0xa   :  { %71 = vmatpush.bf16.msra.mxu0 %v117_v2 }
   0xe   :  { %72 = vmatpush.bf16.msra.mxu0 %v116_v3 }
  0x11   :  { %114 = vmatmul.msk.bf16.vlgmr.msra.gmra.mxu0 %vm61_vm0, %v115_v4 }
  0x8e   :  { %v74_v8 = vpop.f32.mrf.mxu0 }
  0x8f   :  { %v75_v9 = vadd.f32 %v124_v6, %v74_v8 }
  0x91   :  { %v83_v10 = vadd.f32 %v122_v7, %v75_v9 }
  0x93   :  { %v85_v11 = vpack.c.bf16 %v83_v10, %v83_v10 }
  0x95   :  { %88 = vst.msk [vmem:[%s181_s4] sm:$0xf] %vm87_vm1, %v85_v11 }
  0x96   :  { %v76_v13 = vpop.f32.mrf.mxu0 }
  0x97   :  { %v77_v14 = vadd.f32 %v124_v6, %v76_v13 }
  0x99   :  { %v84_v15 = vadd.f32 %v123_v12, %v77_v14 }
  0x9b   :  { %v86_v16 = vpack.c.bf16 %v84_v15, %v84_v15 }
  0x9d   :  { %89 = vst.msk [vmem:[%s181_s4 + $0x4] sm:$0xf] %vm87_vm1, %v86_v16 }

// kernel: llama3_forward.10
= control target key start
LH: loop header
LB: loop body
LE: loop exit
PB: predicated region body
PF: predicated region fallthrough
CT: control target
= control target key end

     0   :  { %vm28_vm0 = vcmask 523264   ;;  %v188_v7 = vmov 64.0   ;;  %vm76_vm5 = vcmask 519168   ;;  %vm142_vm9 = vcmask 781312   ;;  %s244_s0 = inlined_call_operand.vmem [shape: bf16[16,64], index: 0, kind: input, shape index: {}]   ;;  %s245_s1 = inlined_call_operand.vmem [shape: f32[1,64], index: 1, kind: input, shape index: {}]   ;;  %s246_s3 = inlined_call_operand.vmem [shape: f32[1,96], index: 3, kind: input, shape index: {}]   ;;  %s247_s2 = inlined_call_operand.vmem [shape: bf16[64,96], index: 2, kind: input, shape index: {}]   ;;  %s248_s4 = inlined_call_operand.vmem [shape: bf16[16,96], index: 4, kind: output, shape index: {}]  }
   0x1   :  { %v176_v0 = vld [vmem:[%s244_s0] sm:$0xff]   ;;  %182 = vrcp.f32 %v188_v7  ;;  %v174_v13 = vld [vmem:[%s247_s2 + $0x18] sm:$0xff]  ;;  %v173_v17 = vld [vmem:[%s247_s2 + $0x10] sm:$0xff] }
   0x2   :  { %v177_v1 = vunpack.c.l.bf16 %v176_v0  ;;  %v178_v3 = vunpack.c.h.bf16 %v176_v0  ;;  %130 = vmatpush.bf16.msra.mxu0 %v174_v13  ;;  %v172_v19 = vld [vmem:[%s247_s2 + $0x8] sm:$0xff]  ;;  %v171_v20 = vld [vmem:[%s247_s2] sm:$0xff] }
   0x3   :  { %v180_v32 = vld [vmem:[%s245_s1] ss:$0 sm:$0xff] }
   0x4   :  { %v26_v2 = vmul.f32 %v177_v1, %v177_v1  ;;  %v27_v5 = vmul.f32 %v178_v3, %v178_v3  ;;  %v181_v46 = vld [vmem:[%s246_s3] ss:$0 sm:$0xff] }
   0x6   :  { %v29_v4 = vsel %vm28_vm0, %v26_v2, 0.0  ;;  %v32_v6 = vsel %vm28_vm0, %v27_v5, 0.0  ;;  %131 = vmatpush.bf16.msra.mxu0 %v173_v17 }
   0x7   :  { %30 = vadd.xlane.f32.xlu0 %v29_v4  ;;  %v183_v8 = vpop.eup %182 }
   0x8   :  { %v36_v9 = vmul.f32 64.0, %v183_v8  ;;  %vm40_vm1 = vweird.f32 %v183_v8 }
   0xa   :  { %v37_v10 = vsub.f32 1.0, %v36_v9  ;;  %132 = vmatpush.bf16.msra.mxu0 %v172_v19 }
   0xc   :  { %v38_v11 = vmul.f32 %v183_v8, %v37_v10 }
   0xe   :  { %v39_v12 = vadd.f32 %v183_v8, %v38_v11  ;;  %133 = vmatpush.bf16.msra.mxu0 %v171_v20 }
   0xf   :  { %33 = vadd.xlane.f32.xlu0 %v32_v6 }
  0x10   :  { %v41_v14 = vsel %vm40_vm1, %v183_v8, %v39_v12 }
  0x7a   :  { %v31_v15 = vpop.xlane.xlu0 %30 }
  0x7b   :  { %v42_v16 = vmul.f32 %v41_v14, %v31_v15 }
  0x7d   :  { %v44_v18 = vadd.f32 1e-06, %v42_v16 }
  0x7f   :  { %184 = vrsqrt.f32 %v44_v18  ;;  %vm52_vm3 = vweird.f32 %v44_v18 }
  0x82   :  { %v34_v21 = vpop.xlane.xlu0 %33 }
  0x83   :  { %v43_v22 = vmul.f32 %v41_v14, %v34_v21 }
  0x85   :  { %v185_v23 = vpop.eup %184  ;;  %v45_v24 = vadd.f32 1e-06, %v43_v22 }
  0x86   :  { %v47_v25 = vmul.f32 %v185_v23, %v44_v18  ;;  %vm53_vm2 = vweird.f32 %v185_v23 }
  0x87   :  { %186 = vrsqrt.f32 %v45_v24  ;;  %vm54_vm4 = vmor %vm52_vm3, %vm53_vm2  ;;  %vm62_vm7 = vweird.f32 %v45_v24 }
  0x88   :  { %v48_v26 = vmul.f32 %v185_v23, %v47_v25 }
  0x8a   :  { %v49_v27 = vmul.f32 0.5, %v48_v26 }
  0x8c   :  { %v50_v28 = vsub.f32 1.5, %v49_v27 }
  0x8d   :  { %v187_v29 = vpop.eup %186 }
  0x8e   :  { %v51_v30 = vmul.f32 %v185_v23, %v50_v28  ;;  %v57_v31 = vmul.f32 %v187_v29, %v45_v24  ;;  %vm63_vm6 = vweird.f32 %v187_v29 }
  0x8f   :  { %vm64_vm8 = vmor %vm62_vm7, %vm63_vm6 }
  0x90   :  { %v55_v33 = vsel %vm54_vm4, %v185_v23, %v51_v30  ;;  %v58_v34 = vmul.f32 %v187_v29, %v57_v31 }
  0x91   :  { %v66_v35 = vmul.f32 %v177_v1, %v55_v33 }
  0x92   :  { %v59_v36 = vmul.f32 0.5, %v58_v34 }
  0x93   :  { %v72_v37 = vmul.f32 %v180_v32, %v66_v35 }
  0x94   :  { %v60_v38 = vsub.f32 1.5, %v59_v36 }
  0x95   :  { %v74_v39 = vpack.c.bf16 %v72_v37, %v72_v37 }
  0x96   :  { %v61_v40 = vmul.f32 %v187_v29, %v60_v38 }
  0x97   :  { %77 = vst.msk [vmem:[#allocation2] sm:$0xf] %vm76_vm5, %v74_v39 }
  0x98   :  { %v65_v41 = vsel %vm64_vm8, %v187_v29, %v61_v40 }
  0x99   :  { %v67_v42 = vmul.f32 %v178_v3, %v65_v41 }
  0x9b   :  { %v73_v43 = vmul.f32 %v180_v32, %v67_v42 }
  0x9d   :  { %v75_v44 = vpack.c.bf16 %v73_v43, %v73_v43 }
  0x9f   :  { %78 = vst.msk [vmem:[#allocation2 + $0x4] sm:$0xf] %vm76_vm5, %v75_v44 }
  0xa6   :  { %v170_v45 = vld [vmem:[#allocation2] sm:$0xff] }
  0xa7   :  { %169 = vmatmul.msk.bf16.vlgmr.msra.gmra.mxu0 %vm28_vm0, %v170_v45 }
 0x124   :  { %v135_v47 = vpop.f32.mrf.mxu0 }
 0x125   :  { %v136_v48 = vadd.f32 %v181_v46, %v135_v47 }
 0x127   :  { %v140_v49 = vpack.c.bf16 %v136_v48, %v136_v48 }
 0x129   :  { %143 = vst.msk [vmem:[%s248_s4] sm:$0xf] %vm142_vm9, %v140_v49 }
 0x12c   :  { %v137_v50 = vpop.f32.mrf.mxu0 }
 0x12d   :  { %v138_v51 = vadd.f32 %v181_v46, %v137_v50 }
 0x12f   :  { %v141_v52 = vpack.c.bf16 %v138_v51, %v138_v51 }
 0x131   :  { %144 = vst.msk [vmem:[%s248_s4 + $0x4] sm:$0xf] %vm142_vm9, %v141_v52 }

// kernel: llama3_forward.11
= control target key start
LH: loop header
LB: loop body
LE: loop exit
PB: predicated region body
PF: predicated region fallthrough
CT: control target
= control target key end

     0   :  { %s810_s12 = smov 0   ;;  %s812_s13 = smov 0   ;;  %s892_s0 = inlined_call_operand.vmem [shape: bf16[2,8,8,8], index: 0, kind: input, shape index: {}]   ;;  %s893_s1 = inlined_call_operand.vmem [shape: bf16[2,2,8,8], index: 1, kind: input, shape index: {}]   ;;  %s894_s2 = inlined_call_operand.vmem [shape: bf16[2,2,8,8], index: 2, kind: input, shape index: {}]   ;;  %s895_s3 = inlined_call_operand.vmem [shape: bf16[2,8,8,8], index: 3, kind: output, shape index: {}]  }
   0x1   :  { %s814_s14 = smov 0   ;;  %s816_s15 = smov 0  }
   0x2   :  { %s818_s16 = smov 0  }
   0x3 LB: > { %s35_s17 = sadd.s32 1, %s777_s14  ;;  %s39_s18 = sadd.s32 1, %s781_s15  ;;  %s785_s16 = sphi %s818_s16, %s13_s16   ;;  %s781_s15 = sphi %s816_s15, %s899_s15   ;;  %s777_s14 = sphi %s814_s14, %s898_s14   ;;  %s773_s13 = sphi %s812_s13, %s897_s13   ;;  %s769_s12 = sphi %s810_s12, %s896_s12  }
   0x4   : > { %p37_p0 = scmp.ge.s32.totalorder %s35_s17, 8  ;;  %p680_p1 = scmp.ge.s32.totalorder %s785_s16, 1 }
   0x5   : > { %p265_p2 = scmp.lt.s32.totalorder %s785_s16, 17 }
   0x6   : > { %s901_s17 = smov (%p37_p0, %s35_s17), 0  ;;  %s903_s18 = smov (!%p37_p0, %s39_s18), %s781_s15 }
   0x7   : > { %p266_p3 = pnand %p680_p1, %p265_p2  ;;  %p41_p4 = scmp.ge.s32.totalorder %s903_s18, 2 }
   0x8   : > { %p335_p5 = scmp.lt.s32.totalorder (!%p266_p3), %s773_s13, 1  ;;  %p346_p6 = scmp.lt.s32.totalorder (!%p266_p3), %s769_s12, 0 }
   0x9   : > { %s905_s18 = smov (%p41_p4, %s903_s18), 0  ;;  %269 = sbr.rel (%p266_p3) target bundleno = 635 (0x27b), region = 32 }
   0xa   : > { %s347_s19 = ssub.s32 (!%p266_p3), 0, %s769_s12  ;;  %p337_p7 = scmp.lt.s32.totalorder (!%p266_p3), %s769_s12, 7 }
   0xb   : > { %s683_s20 = smin.u32 (!%p266_p3), %s769_s12, %s347_s19 }
   0xc   : > { %s349_s21 = sand.u32 (!%p266_p3), 1, %s683_s20  }
   0xd   : > { %s350_s22 = ssub.s32 (!%p266_p3), 0, %s349_s21 }
   0xe   : > { %s907_s13 = smov (!%p335_p5, %s773_s13), 1  ;;  %s909_s22 = smov (!%p346_p6, %s350_s22), %s349_s21  ;;  %vm411_vm0 = vcmask 64512   ;;  %vm408_vm1 = vcmask 7168   ;;  %v787_v3 = vmov 0.0   ;;  %v788_v4 = vmov -1e+30  }
   0xf   : > { %s911_s12 = smov (!%p337_p7, %s769_s12), 7  ;;  %p354_p8 = scmp.lt.s32.totalorder %s909_s22, 1  ;;  %410 = vst.msk [vmem:[#allocation3] sm:$0xff] %vm408_vm1, %v787_v3  ;;  %v444_v5 = vlaneseq  ;;  %v789_v14 = vmov 0   ;;  %vm490_vm3 = vcmask 1043456   ;;  %vm523_vm4 = vcmask 60416  }
  0x10   : > { %s684_s23 = sshll.u32 %s907_s13, 1  ;;  %s681_s24 = sshll.u32 %s907_s13, 3  ;;  %412 = vst.msk [vmem:[#allocation4] sm:$0xff] %vm411_vm0, %v787_v3  ;;  %738 = vset.pattern.permute.xlu0 %v789_v14  ;;  %739 = vset.pattern.permute.xlu1 %v789_v14 }
  0x11   : > { %s913_s22 = smov (!%p354_p8, %s909_s22), 1  ;;  %s842_s26 = sadd.s32 %s681_s24, %s911_s12  ;;  %409 = vst.msk [vmem:[#allocation2] sm:$0xff] %vm408_vm1, %v788_v4  ;;  %v445_v6 = vshrl.u32 %v444_v5, 7  ;;  %v449_v7 = vand.u32 127, %v444_v5  ;;  %740 = vset.pattern.permute.xlu2 %v789_v14 }
  0x12   : > { %s840_s25 = sadd.s32 %s684_s23, %s913_s22  ;;  %s682_s4 = sshll.u32 %s842_s26, 2 }
  0x13   : > { %s685_s27 = sshll.u32 %s840_s25, 2  ;;  %s345_s7 = scalar_lea.vmem %s892_s0, %s682_s4  ;;  %vm452_vm2 = vcmp.gt.s32.totalorder %v449_v7, %v445_v6 }
  0x14   : > { %s362_s30 = scalar_lea.vmem %s893_s1, %s685_s27  ;;  %v420_v2 = vld [vmem:[%s345_s7] sm:$0xf]  ;;  %v453_v9 = vsel %vm452_vm2, -1e+30, %v787_v3  ;;  %s385_s10 = scalar_lea.vmem %s894_s2, %s685_s27 }
  0x15   : > { %v421_v0 = vld [vmem:[%s362_s30] sm:$0xf]  ;;  %s402_s13 = scalar_lea.vmem %s895_s3, %s682_s4 }
  0x16   : > { %v428_v1 = vsel %vm411_vm0, %v421_v0, 0  ;;  %v422_v19 = vld [vmem:[%s385_s10] sm:$0xf]  ;;  %v471_v29 = vld [vmem:[#allocation3] sm:$0xff] }
  0x17   : > { %437 = vmatpush.bf16.xpose.msra.mxu0 %v428_v1  ;;  %v492_v20 = vsel %vm490_vm3, %v422_v19, 0  ;;  %v479_v37 = vld [vmem:[#allocation4] sm:$0xff] }
  0x18   : > { %v455_v15 = vld [vmem:[#allocation2] sm:$0xff]  ;;  %501 = vmatpush.bf16.msra.mxu1 %v492_v20 }
  0x1e   : > { %691 = vmatmul.msk.bf16.vlgmr.msra.gmra.mxu0 %vm411_vm0, %v420_v2 }
  0x9b   : > { %v439_v8 = vpop.f32.mrf.mxu0 }
  0x9c   : > { %v443_v10 = vmul.f32 0.35355338, %v439_v8 }
  0x9e   : > { %v454_v11 = vadd.f32 %v453_v9, %v443_v10 }
  0xa0   : > { %v456_v12 = vsel %vm411_vm0, %v454_v11, -inf }
  0xa1   : > { %457 = vmax.xlane.f32.xlu0 %v456_v12 }
  0xa3   : > { %v441_v13 = vpop.f32.mrf.mxu0 }
 0x114   : > { %v458_v16 = vpop.xlane.xlu0 %457 }
 0x115   : > { %v459_v17 = vmax.f32 %v455_v15, %v458_v16 }
 0x117   : > { %v460_v18 = vsub.f32 %v455_v15, %v459_v17  ;;  %509 = vst.msk [vmem:[#allocation2] sm:$0xff] %vm408_vm1, %v459_v17  ;;  %465 = vperm.xlu0 %738, %v459_v17  }
 0x119   : > { %v461_v27 = vmul.f32 1.442695, %v460_v18 }
 0x189   : > { %v466_v21 = vpop.permute.xlu0 %465 }
 0x18a   : > { %v468_v22 = vsub.f32 %v454_v11, %v466_v21 }
 0x18c   : > { %v469_v23 = vmul.f32 1.442695, %v468_v22 }
 0x18e   : > { %741 = vpow2.f32 %v469_v23 }
 0x18f   : > { %743 = vpow2.f32 %v461_v27 }
 0x194   : > { %v742_v24 = vpop.eup %741 }
 0x195   : > { %v473_v25 = vsel %vm411_vm0, %v742_v24, 0.0  ;;  %v486_v26 = vpack.c.bf16 %v742_v24, %v742_v24  ;;  %v744_v28 = vpop.eup %743 }
 0x196   : > { %474 = vadd.xlane.f32.xlu1 %v473_v25  ;;  %v472_v30 = vmul.f32 %v744_v28, %v471_v29 }
 0x197   : > { %692 = vmatmul.msk.bf16.vlgmr.msra.gmra.mxu1 %vm411_vm0, %v486_v26 }
 0x1af   : > { %482 = vperm.xlu1 %739, %v744_v28  }
 0x209   : > { %v475_v31 = vpop.xlane.xlu1 %474 }
 0x20a   : > { %v476_v32 = vadd.f32 %v475_v31, %v472_v30 }
 0x20c   : > { %478 = vst.msk [vmem:[#allocation3] sm:$0xff] %vm408_vm1, %v476_v32 }
 0x213   : > { %v514_v33 = vld [vmem:[#allocation3] sm:$0xff] }
 0x214   : > { %v503_v34 = vpop.f32.mrf.mxu1  ;;  %745 = vrcp.f32 %v514_v33 }
 0x21a   : > { %v746_v35 = vpop.eup %745 }
 0x21b   : > { %518 = vperm.xlu2 %740, %v746_v35  }
 0x21c   : > { %v505_v36 = vpop.f32.mrf.mxu1 }
 0x221   : > { %v483_v38 = vpop.permute.xlu1 %482 }
 0x222   : > { %v485_v39 = vmul.f32 %v483_v38, %v479_v37 }
 0x224   : > { %v507_v40 = vadd.f32 %v503_v34, %v485_v39 }
 0x226   : > { %508 = vst.msk [vmem:[#allocation4] sm:$0xff] %vm411_vm0, %v507_v40 }
 0x22d   : > { %v513_v41 = vld [vmem:[#allocation4] sm:$0xff] }
 0x275   : > { %v519_v42 = vpop.permute.xlu2 %518 }
 0x276   : > { %v521_v43 = vmul.f32 %v519_v42, %v513_v41 }
 0x278   : > { %v522_v44 = vpack.c.bf16 %v521_v43, %v521_v43 }
 0x27a   : > { %524 = vst.msk [vmem:[%s402_s13] sm:$0xf] %vm523_vm4, %v522_v44 }
 0x27b PF: > { %s13_s16 = sadd.s32 1, %s785_s16   ;;  %s896_s12 = smov %s777_s14 }
 0x27c   : > { %p10_p9 = scmp.ge.s32.totalorder %s13_s16, 18   ;;  %s897_s13 = smov %s781_s15 }
 0x27d   : > { %s898_s14 = smov %s901_s17  ;;  %s899_s15 = smov %s905_s18 }
 0x27e   :  { %12 = sbr.rel (!%p10_p9) target bundleno = 3 (0x3), region = 80 }

// kernel: llama3_forward.18
= control target key start
LH: loop header
LB: loop body
LE: loop exit
PB: predicated region body
PF: predicated region fallthrough
CT: control target
= control target key end

     0   :  { %vm14_vm0 = vcmask 517120   ;;  %v56_v4 = vmov 64.0   ;;  %vm44_vm5 = vcmask 516096   ;;  %s81_s0 = inlined_call_operand.vmem [shape: bf16[2,64], index: 0, kind: input, shape index: {}]   ;;  %s82_s1 = inlined_call_operand.vmem [shape: f32[1,64], index: 1, kind: input, shape index: {}]   ;;  %s83_s2 = inlined_call_operand.vmem [shape: bf16[2,64], index: 2, kind: output, shape index: {}]  }
   0x1   :  { %v11_v0 = vld [vmem:[%s81_s0] sm:$0x1]  ;;  %52 = vrcp.f32 %v56_v4 }
   0x2   :  { %v12_v1 = vunpack.c.l.bf16 %v11_v0  ;;  %v51_v20 = vld [vmem:[%s82_s1] ss:$0 sm:$0xff] }
   0x4   :  { %v13_v2 = vmul.f32 %v12_v1, %v12_v1 }
   0x6   :  { %v15_v3 = vsel %vm14_vm0, %v13_v2, 0.0 }
   0x7   :  { %16 = vadd.xlane.f32.xlu0 %v15_v3  ;;  %v53_v5 = vpop.eup %52 }
   0x8   :  { %v19_v6 = vmul.f32 64.0, %v53_v5  ;;  %vm23_vm1 = vweird.f32 %v53_v5 }
   0xa   :  { %v20_v7 = vsub.f32 1.0, %v19_v6 }
   0xc   :  { %v21_v8 = vmul.f32 %v53_v5, %v20_v7 }
   0xe   :  { %v22_v9 = vadd.f32 %v53_v5, %v21_v8 }
  0x10   :  { %v24_v10 = vsel %vm23_vm1, %v53_v5, %v22_v9 }
  0x7a   :  { %v17_v11 = vpop.xlane.xlu0 %16 }
  0x7b   :  { %v25_v12 = vmul.f32 %v24_v10, %v17_v11 }
  0x7d   :  { %v26_v13 = vadd.f32 1e-06, %v25_v12 }
  0x7f   :  { %54 = vrsqrt.f32 %v26_v13  ;;  %vm33_vm3 = vweird.f32 %v26_v13 }
  0x85   :  { %v55_v14 = vpop.eup %54 }
  0x86   :  { %v28_v15 = vmul.f32 %v55_v14, %v26_v13  ;;  %vm34_vm2 = vweird.f32 %v55_v14 }
  0x87   :  { %vm35_vm4 = vmor %vm33_vm3, %vm34_vm2 }
  0x88   :  { %v29_v16 = vmul.f32 %v55_v14, %v28_v15 }
  0x8a   :  { %v30_v17 = vmul.f32 0.5, %v29_v16 }
  0x8c   :  { %v31_v18 = vsub.f32 1.5, %v30_v17 }
  0x8e   :  { %v32_v19 = vmul.f32 %v55_v14, %v31_v18 }
  0x90   :  { %v36_v21 = vsel %vm35_vm4, %v55_v14, %v32_v19 }
  0x91   :  { %v37_v22 = vmul.f32 %v36_v21, %v12_v1 }
  0x93   :  { %v42_v23 = vmul.f32 %v51_v20, %v37_v22 }
  0x95   :  { %v43_v24 = vpack.c.bf16 %v42_v23, %v42_v23 }
  0x97   :  { %45 = vst.msk [vmem:[%s83_s2] sm:$0x1] %vm44_vm5, %v43_v24 }

// kernel: llama3_forward.19
= control target key start
LH: loop header
LB: loop body
LE: loop exit
PB: predicated region body
PF: predicated region fallthrough
CT: control target
= control target key end

     0   :  { %s271_s0 = inlined_call_operand.vmem [shape: bf16[2,64], index: 0, kind: input, shape index: {}]   ;;  %s272_s1 = inlined_call_operand.vmem [shape: bf16[64,256], index: 1, kind: input, shape index: {}]   ;;  %s273_s2 = inlined_call_operand.vmem [shape: f32[1,256], index: 2, kind: input, shape index: {}]   ;;  %s274_s3 = inlined_call_operand.hbm [shape: f32[2,256], index: 3, kind: output, shape index: {}]  }
   0x1   :  { %v150_v0 = vld [vmem:[%s272_s1 + $0x30] sm:$0xf]  ;;  %v165_v1 = vld [vmem:[%s272_s1 + $0x34] sm:$0xf0]  ;;  %v164_v2 = vld [vmem:[%s272_s1 + $0x34] sm:$0xf] }
   0x2   :  { %v151_v3 = vor.u32 %v165_v1, %v150_v0  ;;  %v152_v4 = vld [vmem:[%s272_s1 + $0x38] sm:$0xf0]  ;;  %v142_v5 = vld [vmem:[%s272_s1 + $0x20] sm:$0xf]  ;;  %v163_v6 = vld [vmem:[%s272_s1 + $0x24] sm:$0xf0] }
   0x3   :  { %v155_v7 = vor.u32 %v164_v2, %v152_v4  ;;  %v162_v8 = vld [vmem:[%s272_s1 + $0x24] sm:$0xf]  ;;  %v144_v9 = vld [vmem:[%s272_s1 + $0x28] sm:$0xf0]  ;;  %v143_v10 = vor.u32 %v163_v6, %v142_v5  ;;  %v134_v12 = vld [vmem:[%s272_s1 + $0x10] sm:$0xf] }
   0x4   :  { %79 = vmatpush.bf16.msra.mxu0 %v151_v3  ;;  %v147_v11 = vor.u32 %v162_v8, %v144_v9  ;;  %v161_v13 = vld [vmem:[%s272_s1 + $0x14] sm:$0xf0]  ;;  %v160_v14 = vld [vmem:[%s272_s1 + $0x14] sm:$0xf]  ;;  %v136_v15 = vld [vmem:[%s272_s1 + $0x18] sm:$0xf0] }
   0x5   :  { %92 = vmatpush.bf16.msra.mxu1 %v155_v7 }
   0x6   :  { %8 = vsyncpa [#allocation3], 0  ;;  %v135_v16 = vor.u32 %v161_v13, %v134_v12  ;;  %v139_v17 = vor.u32 %v160_v14, %v136_v15  ;;  %v126_v18 = vld [vmem:[%s272_s1] sm:$0xf]  ;;  %v159_v19 = vld [vmem:[%s272_s1 + $0x4] sm:$0xf0] }
   0x7   :  { %v158_v20 = vld [vmem:[%s272_s1 + $0x4] sm:$0xf]  ;;  %v128_v21 = vld [vmem:[%s272_s1 + $0x8] sm:$0xf0]  ;;  %v127_v22 = vor.u32 %v159_v19, %v126_v18  ;;  %v16_v24 = vld [vmem:[%s271_s0] sm:$0x1] }
   0x8   :  { %80 = vmatpush.bf16.msra.mxu0 %v143_v10  ;;  %v131_v23 = vor.u32 %v158_v20, %v128_v21  ;;  %vm71_vm0 = vcmask 523264   ;;  %v25_v25 = vld [vmem:[%s273_s2] sm:$0x3]  ;;  %s193_s1 = smov [#allocation2]   ;;  %s115_s24 = sshll.u32 %s274_s3, 4  ;;  %vm104_vm1 = vcmask 1041408   ;;  %s116_s24 = int_to_ptr.hbm [resolvable:$true] %s115_s24 }
   0x9   :  { %93 = vmatpush.bf16.msra.mxu1 %v147_v11  ;;  %v28_v26 = vperm.slane %v25_v25, 1  ;;  %v27_v27 = vperm.slane %v25_v25, 0  ;;  %s113_s21 = sshll.u32 %s193_s1, 4  ;;  %s114_s21 = int_to_ptr.vmem [resolvable:$true] %s113_s21 }
   0xc   :  { %81 = vmatpush.bf16.msra.mxu0 %v135_v16 }
   0xd   :  { %94 = vmatpush.bf16.msra.mxu1 %v139_v17 }
  0x10   :  { %82 = vmatpush.bf16.msra.mxu0 %v127_v22 }
  0x11   :  { %95 = vmatpush.bf16.msra.mxu1 %v131_v23 }
  0x13   :  { %156 = vmatmul.msk.bf16.vlgmr.msra.gmra.mxu0 %vm71_vm0, %v16_v24 }
  0x14   :  { %157 = vmatmul.msk.bf16.vlgmr.msra.gmra.mxu1 %vm71_vm0, %v16_v24 }
  0x90   :  { %v84_v28 = vpop.f32.mrf.mxu0 }
  0x91   :  { %v97_v29 = vpop.f32.mrf.mxu1  ;;  %v85_v31 = vadd.f32 %v84_v28, %v27_v27 }
  0x92   :  { %v98_v30 = vadd.f32 %v97_v29, %v28_v26 }
  0x94   :  { %v103_v32 = vrot.slane %v98_v30, 6 }
  0x96   :  { %v105_v33 = vsel %vm104_vm1, %v85_v31, %v103_v32 }
  0x97   :  { %107 = vst [vmem:[#allocation2] sm:$0xf] %v105_v33 }
  0x98   :  { %v86_v34 = vpop.f32.mrf.mxu0  ;;  %118 = dma.vmem_to_hbm [thread:$0]  %s114_s21, 64, %s116_s24, [#allocation3]  }
  0x99   :  { %v99_v35 = vpop.f32.mrf.mxu1 }
  0x9a   :  { %191 = dma.done.wait [#allocation3], 64  }
  0x9b   :  { %192 = vsyncadd [#allocation3], 4294967232 }
  0x9c   :  { %123 = vsyncpa [#allocation3], 1 }

// kernel: llama3_forward.13
= control target key start
LH: loop header
LB: loop body
LE: loop exit
PB: predicated region body
PF: predicated region fallthrough
CT: control target
= control target key end

     0   :  { %vm40_vm0 = vcmask 523264   ;;  %v444_v7 = vmov 64.0   ;;  %vm88_vm5 = vcmask 519168   ;;  %v445_v63 = vmov 0.0   ;;  %s584_s0 = inlined_call_operand.vmem [shape: bf16[16,64], index: 0, kind: input, shape index: {}, may-alias: {0,8}]   ;;  %s585_s1 = inlined_call_operand.vmem [shape: f32[1,64], index: 1, kind: input, shape index: {}]   ;;  %s586_s3 = inlined_call_operand.vmem [shape: f32[1,128], index: 3, kind: input, shape index: {}]   ;;  %s587_s2 = inlined_call_operand.vmem [shape: bf16[64,128], index: 2, kind: input, shape index: {}]   ;;  %s588_s4 = inlined_call_operand.vmem [shape: bf16[64,128], index: 4, kind: input, shape index: {}]   ;;  %s589_s5 = inlined_call_operand.vmem [shape: f32[1,128], index: 5, kind: input, shape index: {}]   ;;  %s590_s7 = inlined_call_operand.vmem [shape: f32[1,64], index: 7, kind: input, shape index: {}]   ;;  %s591_s6 = inlined_call_operand.vmem [shape: bf16[128,64], index: 6, kind: input, shape index: {}]   ;;  %s592_s8 = inlined_call_operand.vmem [shape: bf16[16,64], index: 8, kind: output, shape index: {}, may-alias: {0,8}]  }
   0x1   :  { %v417_v0 = vld [vmem:[%s584_s0] sm:$0xff]   ;;  %430 = vrcp.f32 %v444_v7  ;;  %v403_v13 = vld [vmem:[%s587_s2 + $0x18] sm:$0xff]  ;;  %v402_v18 = vld [vmem:[%s587_s2 + $0x10] sm:$0xff]  ;;  %91 = vst.msk [vmem:[#allocation2] sm:$0xff] %vm40_vm0, %v445_v63 }
   0x2   :  { %v494_v1 = vunpack.c.l.bf16 %v417_v0  ;;  %v498_v3 = vunpack.c.h.bf16 %v417_v0  ;;  %v407_v14 = vld [vmem:[%s588_s4 + $0x18] sm:$0xff]  ;;  %144 = vmatpush.bf16.msra.mxu0 %v403_v13  ;;  %v406_v19 = vld [vmem:[%s588_s4 + $0x10] sm:$0xff]  ;;  %v401_v21 = vld [vmem:[%s587_s2 + $0x8] sm:$0xff]  ;;  %92 = vst.msk [vmem:[#allocation2 + $0x8] sm:$0xff] %vm40_vm0, %v445_v63 }
   0x3   :  { %194 = vmatpush.bf16.msra.mxu1 %v407_v14  ;;  %v405_v22 = vld [vmem:[%s588_s4 + $0x8] sm:$0xff]  ;;  %v400_v23 = vld [vmem:[%s587_s2] sm:$0xff]  ;;  %v415_v50 = vld [vmem:[%s591_s6 + $0x38] sm:$0xff] }
   0x4   :  { %v38_v2 = vmul.f32 %v494_v1, %v494_v1  ;;  %v39_v5 = vmul.f32 %v498_v3, %v498_v3  ;;  %v404_v24 = vld [vmem:[%s588_s4] sm:$0xff]  ;;  %285 = vmatpush.bf16.msra.mxu2 %v415_v50  ;;  %v414_v51 = vld [vmem:[%s591_s6 + $0x30] sm:$0xff]  ;;  %v413_v52 = vld [vmem:[%s591_s6 + $0x28] sm:$0xff] }
   0x5   :  { %v426_v36 = vld [vmem:[%s585_s1] ss:$0 sm:$0xff]  ;;  %v411_v54 = vld [vmem:[%s591_s6 + $0x18] sm:$0xff]  ;;  %v410_v55 = vld [vmem:[%s591_s6 + $0x10] sm:$0xff] }
   0x6   :  { %v41_v4 = vsel %vm40_vm0, %v38_v2, 0.0  ;;  %v44_v6 = vsel %vm40_vm0, %v39_v5, 0.0  ;;  %145 = vmatpush.bf16.msra.mxu0 %v402_v18  ;;  %v412_v53 = vld [vmem:[%s591_s6 + $0x20] sm:$0xff]  ;;  %v409_v56 = vld [vmem:[%s591_s6 + $0x8] sm:$0xff] }
   0x7   :  { %42 = vadd.xlane.f32.xlu0 %v41_v4  ;;  %v431_v8 = vpop.eup %430  ;;  %195 = vmatpush.bf16.msra.mxu1 %v406_v19  ;;  %v428_v57 = vld [vmem:[%s589_s5] ss:$0 sm:$0xff] }
   0x8   :  { %v48_v9 = vmul.f32 64.0, %v431_v8  ;;  %vm52_vm1 = vweird.f32 %v431_v8  ;;  %286 = vmatpush.bf16.msra.mxu2 %v414_v51  ;;  %v408_v58 = vld [vmem:[%s591_s6] sm:$0xff] }
   0xa   :  { %v49_v10 = vsub.f32 1.0, %v48_v9  ;;  %146 = vmatpush.bf16.msra.mxu0 %v401_v21 }
   0xb   :  { %196 = vmatpush.bf16.msra.mxu1 %v405_v22  ;;  %v219_v22 = vld [vmem:[#allocation2] sm:$0xff] }
   0xc   :  { %v50_v11 = vmul.f32 %v431_v8, %v49_v10  ;;  %287 = vmatpush.bf16.msra.mxu2 %v413_v52 }
   0xe   :  { %v51_v12 = vadd.f32 %v431_v8, %v50_v11  ;;  %147 = vmatpush.bf16.msra.mxu0 %v400_v23 }
   0xf   :  { %45 = vadd.xlane.f32.xlu0 %v44_v6  ;;  %197 = vmatpush.bf16.msra.mxu1 %v404_v24 }
  0x10   :  { %v53_v15 = vsel %vm52_vm1, %v431_v8, %v51_v12  ;;  %288 = vmatpush.bf16.msra.mxu2 %v412_v53  ;;  %v427_v12 = vld [vmem:[%s586_s3] ss:$0 sm:$0xff] }
  0x14   :  { %289 = vmatpush.bf16.msra.mxu2 %v411_v54 }
  0x18   :  { %290 = vmatpush.bf16.msra.mxu2 %v410_v55 }
  0x1c   :  { %291 = vmatpush.bf16.msra.mxu2 %v409_v56 }
  0x20   :  { %292 = vmatpush.bf16.msra.mxu2 %v408_v58 }
  0x7a   :  { %v43_v16 = vpop.xlane.xlu0 %42 }
  0x7b   :  { %v54_v17 = vmul.f32 %v53_v15, %v43_v16 }
  0x7d   :  { %v56_v20 = vadd.f32 1e-06, %v54_v17 }
  0x7f   :  { %432 = vrsqrt.f32 %v56_v20  ;;  %vm64_vm3 = vweird.f32 %v56_v20 }
  0x82   :  { %v46_v25 = vpop.xlane.xlu0 %45 }
  0x83   :  { %v55_v26 = vmul.f32 %v53_v15, %v46_v25  ;;  %v220_v25 = vld [vmem:[#allocation2 + $0x8] sm:$0xff] }
  0x85   :  { %v433_v27 = vpop.eup %432  ;;  %v57_v28 = vadd.f32 1e-06, %v55_v26 }
  0x86   :  { %v59_v29 = vmul.f32 %v433_v27, %v56_v20  ;;  %vm65_vm2 = vweird.f32 %v433_v27 }
  0x87   :  { %434 = vrsqrt.f32 %v57_v28  ;;  %vm66_vm4 = vmor %vm64_vm3, %vm65_vm2  ;;  %vm74_vm7 = vweird.f32 %v57_v28 }
  0x88   :  { %v60_v30 = vmul.f32 %v433_v27, %v59_v29 }
  0x8a   :  { %v61_v31 = vmul.f32 0.5, %v60_v30 }
  0x8c   :  { %v62_v32 = vsub.f32 1.5, %v61_v31 }
  0x8d   :  { %v435_v33 = vpop.eup %434 }
  0x8e   :  { %v63_v34 = vmul.f32 %v433_v27, %v62_v32  ;;  %v69_v35 = vmul.f32 %v435_v33, %v57_v28  ;;  %vm75_vm6 = vweird.f32 %v435_v33 }
  0x8f   :  { %vm76_vm8 = vmor %vm74_vm7, %vm75_vm6 }
  0x90   :  { %v67_v37 = vsel %vm66_vm4, %v433_v27, %v63_v34  ;;  %v70_v38 = vmul.f32 %v435_v33, %v69_v35  ;;  %v429_v27 = vld [vmem:[%s590_s7] ss:$0 sm:$0xff] }
  0x91   :  { %v78_v39 = vmul.f32 %v494_v1, %v67_v37 }
  0x92   :  { %v71_v40 = vmul.f32 0.5, %v70_v38 }
  0x93   :  { %v84_v41 = vmul.f32 %v426_v36, %v78_v39 }
  0x94   :  { %v72_v42 = vsub.f32 1.5, %v71_v40 }
  0x95   :  { %v86_v43 = vpack.c.bf16 %v84_v41, %v84_v41 }
  0x96   :  { %v73_v44 = vmul.f32 %v435_v33, %v72_v42 }
  0x97   :  { %89 = vst.msk [vmem:[#allocation3] sm:$0xf] %vm88_vm5, %v86_v43 }
  0x98   :  { %v77_v45 = vsel %vm76_vm8, %v435_v33, %v73_v44 }
  0x99   :  { %v79_v46 = vmul.f32 %v498_v3, %v77_v45 }
  0x9b   :  { %v85_v47 = vmul.f32 %v426_v36, %v79_v46 }
  0x9d   :  { %v87_v48 = vpack.c.bf16 %v85_v47, %v85_v47 }
  0x9f   :  { %90 = vst.msk [vmem:[#allocation3 + $0x4] sm:$0xf] %vm88_vm5, %v87_v48 }
  0xa6   :  { %v399_v49 = vld [vmem:[#allocation3] sm:$0xff] }
  0xa7   :  { %349 = vmatmul.msk.bf16.vlgmr.msra.gmra.mxu0 %vm40_vm0, %v399_v49  ;;  %366 = vmatmul.msk.bf16.vlgmr.msra.gmra.mxu1 %vm40_vm0, %v399_v49 }
 0x124   :  { %v199_v59 = vpop.f32.mrf.mxu1  ;;  %v149_v8 = vpop.f32.mrf.mxu0 }
 0x125   :  { %v200_v60 = vadd.f32 %v428_v57, %v199_v59  ;;  %v150_v16 = vadd.f32 %v427_v12, %v149_v8 }
 0x127   :  { %v204_v61 = vsub.f32 0.0, %v200_v60 }
 0x129   :  { %v206_v62 = vmul.f32 1.442695, %v204_v61 }
 0x12b   :  { %436 = vpow2.f32 %v206_v62 }
 0x12c   :  { %v201_v0 = vpop.f32.mrf.mxu1  ;;  %v151_v13 = vpop.f32.mrf.mxu0 }
 0x12d   :  { %v202_v2 = vadd.f32 %v428_v57, %v201_v0  ;;  %v152_v17 = vadd.f32 %v427_v12, %v151_v13 }
 0x12f   :  { %v205_v4 = vsub.f32 0.0, %v202_v2 }
 0x131   :  { %v437_v5 = vpop.eup %436  ;;  %v208_v6 = vmul.f32 1.442695, %v205_v4 }
 0x132   :  { %v210_v7 = vadd.f32 1.0, %v437_v5 }
 0x133   :  { %438 = vpow2.f32 %v208_v6 }
 0x134   :  { %440 = vrcp.f32 %v210_v7 }
 0x139   :  { %v439_v9 = vpop.eup %438 }
 0x13a   :  { %v211_v10 = vadd.f32 1.0, %v439_v9  ;;  %v441_v11 = vpop.eup %440 }
 0x13b   :  { %v214_v14 = vmul.f32 %v441_v11, %v200_v60 }
 0x13c   :  { %442 = vrcp.f32 %v211_v10 }
 0x13d   :  { %v216_v19 = vmul.f32 %v214_v14, %v150_v16 }
 0x142   :  { %v443_v15 = vpop.eup %442 }
 0x143   :  { %v215_v18 = vmul.f32 %v443_v15, %v202_v2 }
 0x145   :  { %v217_v20 = vmul.f32 %v215_v18, %v152_v17 }
 0x147   :  { %v218_v21 = vpack.c.bf16 %v217_v20, %v216_v19 }
 0x149   :  { %293 = vmatmul.bf16.vlgmr.msra.gmra.mxu2 %v218_v21 }
 0x1cc   :  { %v294_v23 = vpop.f32.mrf.mxu2 }
 0x1cd   :  { %v299_v24 = vadd.f32 %v294_v23, %v219_v22 }
 0x1cf   :  { %301 = vst.msk [vmem:[#allocation2] sm:$0xff] %vm40_vm0, %v299_v24 }
 0x1d4   :  { %v296_v26 = vpop.f32.mrf.mxu2 }
 0x1d5   :  { %v300_v28 = vadd.f32 %v296_v26, %v220_v25 }
 0x1d6   :  { %v310_v29 = vld [vmem:[#allocation2] sm:$0xff] }
 0x1d7   :  { %v312_v30 = vadd.f32 %v494_v1, %v310_v29  ;;  %302 = vst.msk [vmem:[#allocation2 + $0x8] sm:$0xff] %vm40_vm0, %v300_v28 }
 0x1d9   :  { %v318_v31 = vadd.f32 %v429_v27, %v312_v30 }
 0x1db   :  { %v320_v32 = vpack.c.bf16 %v318_v31, %v318_v31 }
 0x1dd   :  { %323 = vst.msk [vmem:[%s592_s8] sm:$0xf] %vm88_vm5, %v320_v32 }
 0x1de   :  { %v311_v33 = vld [vmem:[#allocation2 + $0x8] sm:$0xff] }
 0x1df   :  { %v313_v34 = vadd.f32 %v498_v3, %v311_v33 }
 0x1e1   :  { %v319_v35 = vadd.f32 %v429_v27, %v313_v34 }
 0x1e3   :  { %v321_v36 = vpack.c.bf16 %v319_v35, %v319_v35 }
 0x1e5   :  { %324 = vst.msk [vmem:[%s592_s8 + $0x4] sm:$0xf] %vm88_vm5, %v321_v36 }

</bundles_post_ra>
